<compile_context>
chip_gen: v7x
topology: tpu7x:2x2x1
jax: 0.10.0
libtpu: 0.0.40
codegen_flags: <defaults>
</compile_context>

<pallas_src>
import jax
import jax.numpy as jnp
from jax import lax
from jax.experimental import pallas as pl
from jax.experimental.pallas import tpu as pltpu


# ----------------------------------------------------------------------------
# Pallas kernel: fused self.top (three 1x1 convs) on a TILE_N-row slab of z
# (the getStats/concat contribution arrives pre-folded as a per-batch bias).
# ----------------------------------------------------------------------------
def _head_kernel(z_ref, bias1_ref, w1z_ref, w2_ref, b2_ref, w3_ref, o_ref):
    w1z = w1z_ref[...]                       # (C, 512)  bf16
    w2 = w2_ref[...]                         # (512, 256) bf16
    b2 = b2_ref[...]                         # (1, 256)  f32
    w3 = w3_ref[...]                         # (1, 256)  f32
    B = z_ref.shape[0]
    # Static unroll over the (small) batch: each iteration is a clean 2-D MXU matmul
    # chain, avoiding 3-D dot_general and (B*N,C)<->(B,N,C) reshapes inside the kernel.
    for b in range(B):
        zb = z_ref[b]                        # (TILE_N, C) bf16
        # Conv1x1(3C->C) with the channel-concat folded into bias1 (per-batch, f32).
        y1 = jnp.dot(zb, w1z, preferred_element_type=jnp.float32) + bias1_ref[b]
        y1 = jnp.maximum(y1, 0.0).astype(jnp.bfloat16)
        # Conv1x1(C->256) + ReLU
        y2 = jnp.dot(y1, w2, preferred_element_type=jnp.float32) + b2
        y2 = jnp.maximum(y2, 0.0)            # (TILE_N, 256) f32
        # Conv1x1(256->1, no bias): VPU multiply + lane reduction (skip the MXU).
        y3 = jnp.sum(y2 * w3, axis=-1)       # (TILE_N,)
        o_ref[b, :] = y3.astype(o_ref.dtype)


def _pick_tile_n(n):
    # Full block for small spatial sizes (block == full dim is always legal); otherwise a
    # 128-aligned tile that keeps the per-step working set far below v7x's 64 MiB VMEM.
    if n <= 512:
        return n
    for cand in (512, 384, 256, 128):
        if n % cand == 0:
            return cand
    return 512  # uneven tail handled by Pallas partial-block masking


def head_pallas(z_bnc, p, tile_n=None):
    """z_bnc: (B, N, C) f32 with N = H*W pixels; returns (B, N) f32 scores."""
    B, N, C = z_bnc.shape
    assert N > 1, "unbiased std requires at least 2 spatial positions"

    # getStats in plain JAX f32 (exact torch semantics: unbiased N-1, sqrt(var)+1e-9),
    # folded into a tiny per-batch bias:
    #   cat(z, mu, std) @ W1 + b1 == z @ W1z + (mu @ W1m + std @ W1s + b1)
    mu = jnp.mean(z_bnc, axis=1)                                      # (B, C)
    var = jnp.sum((z_bnc - mu[:, None, :]) ** 2, axis=1) / float(N - 1)
    std = jnp.sqrt(var) + 1e-9                                        # sqrt(var)+eps, NOT sqrt(var+eps)
    bias1 = mu @ p["w1m"] + std @ p["w1s"] + p["b1"]                  # (B, 512) f32

    # Ship z to the kernel in bf16: halves the z DMA and VMEM footprint; f32 accumulation
    # inside the kernel keeps the matmul error to operand rounding only.
    z_bf16 = z_bnc.astype(jnp.bfloat16)

    tile_n = tile_n or _pick_tile_n(N)
    num_tiles = pl.cdiv(N, tile_n)

    # Conservative, explicit scoped-VMEM budget (actual working set is a few MiB).
    vmem_limit = 32 * 1024 * 1024

    return pl.pallas_call(
        _head_kernel,
        out_shape=jax.ShapeDtypeStruct((B, N), jnp.float32),
        grid=(num_tiles,),
        in_specs=[
            pl.BlockSpec((B, tile_n, C), lambda t: (0, t, 0)),        # z slab (pipelined)
            pl.BlockSpec((B, C), lambda t: (0, 0)),                   # folded bias (resident)
            pl.BlockSpec(p["w1z"].shape, lambda t: (0, 0)),           # weights (resident)
            pl.BlockSpec(p["w2"].shape, lambda t: (0, 0)),
            pl.BlockSpec(p["b2"].shape, lambda t: (0, 0)),
            pl.BlockSpec(p["w3"].shape, lambda t: (0, 0)),
        ],
        out_specs=pl.BlockSpec((B, tile_n), lambda t: (0, t)),
        compiler_params=pltpu.CompilerParams(
            dimension_semantics=("parallel",),                        # v7x: shard tiles over 2 TCs
            vmem_limit_bytes=vmem_limit,
        ),
    )(z_bf16, bias1, p["w1z"], p["w2"], p["b2"], p["w3"])


def prepare_top_params(w1, b1, w2, b2, w3):
    """Split/cast the `self.top` params into the kernel layout.

    w1: (3C, C) [in, out] for Conv1x1(3C->C);  b1: (1, C)
    w2: (C, 256);  b2: (1, 256);  w3: (256, 1) no bias.
    """
    C = w1.shape[0] // 3
    return {
        "w1z": w1[:C].astype(jnp.bfloat16),            # z path: bf16 MXU operand
        "w1m": w1[C:2 * C].astype(jnp.float32),        # mu path: f32, used in JAX bias fold
        "w1s": w1[2 * C:].astype(jnp.float32),         # std path: f32, used in JAX bias fold
        "b1": b1.astype(jnp.float32),
        "w2": w2.astype(jnp.bfloat16),
        "b2": b2.astype(jnp.float32),
        "w3": w3.reshape(1, -1).astype(jnp.float32),   # (1, 256) lane-dense row for VPU
    }


# ----------------------------------------------------------------------------
# self.bot : resnet50 children[:6] in plain JAX, NHWC (no relayout before kernel)
# ----------------------------------------------------------------------------
def conv2d(x, w, stride=1, padding=0):
    return lax.conv_general_dilated(
        x, w, window_strides=(stride, stride),
        padding=[(padding, padding), (padding, padding)],
        dimension_numbers=("NHWC", "HWIO", "NHWC"))


def frozen_bn(x):
    # FrozenBatchNorm2d with weight=1, bias=0, running_mean=0, running_var=1, eps=1e-5
    return x * (1.0 / jnp.sqrt(1.0 + 1e-5))


def _key_stream(seed):
    key = jax.random.PRNGKey(seed)
    while True:
        key, sub = jax.random.split(key)
        yield sub


def _init_conv(key, out_c, in_c, k):
    fan_in = in_c * k * k
    return jax.random.normal(key, (k, k, in_c, out_c), jnp.float32) * (2.0 / fan_in) ** 0.5


def _make_bottleneck(ks, in_c, width, out_c, stride, downsample):
    p = {
        "w1": _init_conv(next(ks), width, in_c, 1),
        "w2": _init_conv(next(ks), width, width, 3),
        "w3": _init_conv(next(ks), out_c, width, 1),
        "stride": stride,
    }
    if downsample:
        p["wd"] = _init_conv(next(ks), out_c, in_c, 1)
    return p


def make_bot_params(ks):
    params = {"conv1": _init_conv(next(ks), 64, 3, 7)}
    # layer1: 3 bottlenecks, 64 -> 256, stride 1, downsample on block 0
    layer1 = [_make_bottleneck(ks, 64, 64, 256, 1, True)]
    layer1 += [_make_bottleneck(ks, 256, 64, 256, 1, False) for _ in range(2)]
    # layer2: 4 bottlenecks, 256 -> 512, stride 2 on block 0 (with downsample)
    layer2 = [_make_bottleneck(ks, 256, 128, 512, 2, True)]
    layer2 += [_make_bottleneck(ks, 512, 128, 512, 1, False) for _ in range(3)]
    params["layer1"] = layer1
    params["layer2"] = layer2
    return params


def bottleneck_fwd(x, p):
    s = p["stride"]
    out = jax.nn.relu(frozen_bn(conv2d(x, p["w1"])))
    out = jax.nn.relu(frozen_bn(conv2d(out, p["w2"], stride=s, padding=1)))
    out = frozen_bn(conv2d(out, p["w3"]))
    if "wd" in p:
        identity = frozen_bn(conv2d(x, p["wd"], stride=s))
    else:
        identity = x
    return jax.nn.relu(out + identity)


def bot_forward(x_nhwc, params):
    x = jax.nn.relu(frozen_bn(conv2d(x_nhwc, params["conv1"], stride=2, padding=3)))
    x = lax.reduce_window(x, -jnp.inf, lax.max, (1, 3, 3, 1), (1, 2, 2, 1),
                          [(0, 0), (1, 1), (1, 1), (0, 0)])
    for p in params["layer1"]:
        x = bottleneck_fwd(x, p)
    for p in params["layer2"]:
        x = bottleneck_fwd(x, p)
    return x                                              # (B, H, W, 512) NHWC


# ----------------------------------------------------------------------------
# Full Discriminator2 forward (NCHW in, NCHW out like the PyTorch module)
# ----------------------------------------------------------------------------
def discriminator2_forward(x_nchw, bot_params, top_params):
    x = jnp.transpose(x_nchw, (0, 2, 3, 1))               # NHWC (cheap: 3 channels)
    z = bot_forward(x, bot_params)                        # (B, H, W, 512) NHWC
    B, H, W, C = z.shape
    z_bnc = z.reshape(B, H * W, C)                        # pure view, no relayout
    out = head_pallas(z_bnc, top_params)                  # (B, H*W) lane-dense
    return out.reshape(B, H, W)[:, None, :, :]            # NCHW (B, 1, H, W)


# ----------------------------------------------------------------------------
# Pure-JAX f32 reference of the fused head (exact original semantics)
# ----------------------------------------------------------------------------
def head_reference(z_bnc, w1, b1, w2, b2, w3):
    n = z_bnc.shape[1]
    mu = jnp.mean(z_bnc, axis=1, keepdims=True)
    var = jnp.sum((z_bnc - mu) ** 2, axis=1, keepdims=True) / (n - 1)
    std = jnp.sqrt(var) + 1e-9
    z2 = jnp.concatenate([z_bnc,
                          jnp.broadcast_to(mu, z_bnc.shape),
                          jnp.broadcast_to(std, z_bnc.shape)], axis=-1)
    y = jax.nn.relu(jnp.einsum("bnk,ko->bno", z2, w1) + b1)
    y = jax.nn.relu(jnp.einsum("bnk,ko->bno", y, w2) + b2)
    y = jnp.einsum("bnk,ko->bno", y, w3)
    return y[..., 0]                                      # (B, N)


if __name__ == "__main__":
    ks = _key_stream(0)
    bot_params = make_bot_params(ks)

    # self.top parameters, stored [in, out]; PyTorch Conv2d weights would be transposed.
    C = 512
    w1 = jax.random.normal(next(ks), (3 * C, C), jnp.float32) / jnp.sqrt(3.0 * C)
    b1 = jax.random.normal(next(ks), (1, C), jnp.float32) * 0.01
    w2 = jax.random.normal(next(ks), (C, 256), jnp.float32) / jnp.sqrt(float(C))
    b2 = jax.random.normal(next(ks), (1, 256), jnp.float32) * 0.01
    w3 = jax.random.normal(next(ks), (256, 1), jnp.float32) / jnp.sqrt(256.0)
    top_params = prepare_top_params(w1, b1, w2, b2, w3)

    # Small RGB input: (B=2, 3, 32, 32) -> z: (2, 4, 4, 512) -> out: (2, 1, 4, 4)
    x = jax.random.normal(jax.random.PRNGKey(0), (2, 3, 32, 32), jnp.float32)

    out = discriminator2_forward(x, bot_params, top_params)
    jax.block_until_ready(out)
    assert out.shape == (2, 1, 4, 4), out.shape

    # Correctness check of the fused Pallas head vs. an f32 pure-JAX reference.
    z = bot_forward(jnp.transpose(x, (0, 2, 3, 1)), bot_params)
    B, H, W, Cz = z.shape
    ref = head_reference(z.reshape(B, H * W, Cz), w1, b1, w2, b2, w3).reshape(B, 1, H, W)
    err = float(jnp.max(jnp.abs(out - ref)))
    scale = float(jnp.max(jnp.abs(ref))) + 1.0
    assert err < 0.1 * scale, (err, scale)                # loose: bf16 MXU operands

    print("KERNEL_OK")
</pallas_src>

<mosaic_0001>
module attributes {stable_mosaic.version = 11 : i64} {
  func.func @_head_kernel(%arg0: i32, %arg1: memref<2x16x512xbf16, #tpu.memory_space<vmem>>, %arg2: memref<2x512xf32, #tpu.memory_space<vmem>>, %arg3: memref<512x512xbf16, #tpu.memory_space<vmem>>, %arg4: memref<512x256xbf16, #tpu.memory_space<vmem>>, %arg5: memref<1x256xf32, #tpu.memory_space<vmem>>, %arg6: memref<1x256xf32, #tpu.memory_space<vmem>>, %arg7: memref<2x16xf32, #tpu.memory_space<vmem>>) attributes {dimension_semantics = [#tpu.dimension_semantics<parallel>], iteration_bounds = array<i64: 1>, scalar_prefetch = 0 : i64, scratch_operands = 0 : i64, tpu.core_type = #tpu.core_type<tc>, window_params = [{transform_indices = @transform_0, window_bounds = array<i64: 2, 16, 512>}, {pipeline_mode = #tpu.pipeline_mode<synchronous>, transform_indices = @transform_1, window_bounds = array<i64: 2, 512>}, {pipeline_mode = #tpu.pipeline_mode<synchronous>, transform_indices = @transform_2, window_bounds = array<i64: 512, 512>}, {pipeline_mode = #tpu.pipeline_mode<synchronous>, transform_indices = @transform_3, window_bounds = array<i64: 512, 256>}, {pipeline_mode = #tpu.pipeline_mode<synchronous>, transform_indices = @transform_4, window_bounds = array<i64: 1, 256>}, {pipeline_mode = #tpu.pipeline_mode<synchronous>, transform_indices = @transform_5, window_bounds = array<i64: 1, 256>}, {transform_indices = @transform_6, window_bounds = array<i64: 2, 16>}]} {
    %c0 = arith.constant 0 : index
    %c0_0 = arith.constant 0 : index
    %0 = vector.load %arg3[%c0, %c0_0] : memref<512x512xbf16, #tpu.memory_space<vmem>>, vector<512x512xbf16>
    %c0_1 = arith.constant 0 : index
    %c0_2 = arith.constant 0 : index
    %1 = vector.load %arg4[%c0_1, %c0_2] : memref<512x256xbf16, #tpu.memory_space<vmem>>, vector<512x256xbf16>
    %c0_3 = arith.constant 0 : index
    %c0_4 = arith.constant 0 : index
    %2 = vector.load %arg5[%c0_3, %c0_4] : memref<1x256xf32, #tpu.memory_space<vmem>>, vector<1x256xf32>
    %c0_5 = arith.constant 0 : index
    %c0_6 = arith.constant 0 : index
    %3 = vector.load %arg6[%c0_5, %c0_6] : memref<1x256xf32, #tpu.memory_space<vmem>>, vector<1x256xf32>
    %c0_7 = arith.constant 0 : index
    %c0_8 = arith.constant 0 : index
    %c0_9 = arith.constant 0 : index
    %4 = vector.load %arg1[%c0_7, %c0_8, %c0_9] : memref<2x16x512xbf16, #tpu.memory_space<vmem>>, vector<1x16x512xbf16>
    %5 = vector.shape_cast %4 : vector<1x16x512xbf16> to vector<16x512xbf16>
    %cst = arith.constant dense<0.000000e+00> : vector<16x512xf32>
    %6 = tpu.matmul %5, %0, %cst {dimension_numbers = #tpu.dot_dimension_numbers<[1], [0], [0], [1], [0, 0, 1, 1], [], []>} : vector<16x512xbf16>, vector<512x512xbf16>, vector<16x512xf32> -> vector<16x512xf32>
    %c0_10 = arith.constant 0 : index
    %c0_11 = arith.constant 0 : index
    %7 = vector.load %arg2[%c0_10, %c0_11] : memref<2x512xf32, #tpu.memory_space<vmem>>, vector<1x512xf32>
    %8 = vector.shape_cast %7 : vector<1x512xf32> to vector<512xf32>
    %9 = vector.shape_cast %8 : vector<512xf32> to vector<1x512xf32>
    %10 = vector.broadcast %9 : vector<1x512xf32> to vector<16x512xf32>
    %11 = arith.addf %6, %10 : vector<16x512xf32>
    %cst_12 = arith.constant 0.000000e+00 : f32
    %12 = vector.broadcast %cst_12 : f32 to vector<16x512xf32>
    %13 = arith.maximumf %11, %12 : vector<16x512xf32>
    %14 = arith.truncf %13 : vector<16x512xf32> to vector<16x512xbf16>
    %cst_13 = arith.constant dense<0.000000e+00> : vector<16x256xf32>
    %15 = tpu.matmul %14, %1, %cst_13 {dimension_numbers = #tpu.dot_dimension_numbers<[1], [0], [0], [1], [0, 0, 1, 1], [], []>} : vector<16x512xbf16>, vector<512x256xbf16>, vector<16x256xf32> -> vector<16x256xf32>
    %16 = vector.broadcast %2 : vector<1x256xf32> to vector<16x256xf32>
    %17 = arith.addf %15, %16 : vector<16x256xf32>
    %cst_14 = arith.constant 0.000000e+00 : f32
    %18 = vector.broadcast %cst_14 : f32 to vector<16x256xf32>
    %19 = arith.maximumf %17, %18 : vector<16x256xf32>
    %20 = vector.broadcast %3 : vector<1x256xf32> to vector<16x256xf32>
    %21 = arith.mulf %19, %20 : vector<16x256xf32>
    %cst_15 = arith.constant dense<0.000000e+00> : vector<16xf32>
    %22 = vector.multi_reduction <add>, %21, %cst_15 [1] : vector<16x256xf32> to vector<16xf32>
    %c0_16 = arith.constant 0 : index
    %c0_17 = arith.constant 0 : index
    %23 = vector.load %arg7[%c0_16, %c0_17] : memref<2x16xf32, #tpu.memory_space<vmem>>, vector<1x16xf32>
    %24 = vector.shape_cast %23 : vector<1x16xf32> to vector<16xf32>
    %25 = vector.shape_cast %22 : vector<16xf32> to vector<1x16xf32>
    tpu.vector_store %arg7[%c0_16, %c0_17], %25 {strides = array<i32>} : memref<2x16xf32, #tpu.memory_space<vmem>>, vector<1x16xf32>,
    %c1 = arith.constant 1 : index
    %c0_18 = arith.constant 0 : index
    %c0_19 = arith.constant 0 : index
    %26 = vector.load %arg1[%c1, %c0_18, %c0_19] : memref<2x16x512xbf16, #tpu.memory_space<vmem>>, vector<1x16x512xbf16>
    %27 = vector.shape_cast %26 : vector<1x16x512xbf16> to vector<16x512xbf16>
    %cst_20 = arith.constant dense<0.000000e+00> : vector<16x512xf32>
    %28 = tpu.matmul %27, %0, %cst_20 {dimension_numbers = #tpu.dot_dimension_numbers<[1], [0], [0], [1], [0, 0, 1, 1], [], []>} : vector<16x512xbf16>, vector<512x512xbf16>, vector<16x512xf32> -> vector<16x512xf32>
    %c1_21 = arith.constant 1 : index
    %c0_22 = arith.constant 0 : index
    %29 = vector.load %arg2[%c1_21, %c0_22] : memref<2x512xf32, #tpu.memory_space<vmem>>, vector<1x512xf32>
    %30 = vector.shape_cast %29 : vector<1x512xf32> to vector<512xf32>
    %31 = vector.shape_cast %30 : vector<512xf32> to vector<1x512xf32>
    %32 = vector.broadcast %31 : vector<1x512xf32> to vector<16x512xf32>
    %33 = arith.addf %28, %32 : vector<16x512xf32>
    %cst_23 = arith.constant 0.000000e+00 : f32
    %34 = vector.broadcast %cst_23 : f32 to vector<16x512xf32>
    %35 = arith.maximumf %33, %34 : vector<16x512xf32>
    %36 = arith.truncf %35 : vector<16x512xf32> to vector<16x512xbf16>
    %cst_24 = arith.constant dense<0.000000e+00> : vector<16x256xf32>
    %37 = tpu.matmul %36, %1, %cst_24 {dimension_numbers = #tpu.dot_dimension_numbers<[1], [0], [0], [1], [0, 0, 1, 1], [], []>} : vector<16x512xbf16>, vector<512x256xbf16>, vector<16x256xf32> -> vector<16x256xf32>
    %38 = vector.broadcast %2 : vector<1x256xf32> to vector<16x256xf32>
    %39 = arith.addf %37, %38 : vector<16x256xf32>
    %cst_25 = arith.constant 0.000000e+00 : f32
    %40 = vector.broadcast %cst_25 : f32 to vector<16x256xf32>
    %41 = arith.maximumf %39, %40 : vector<16x256xf32>
    %42 = vector.broadcast %3 : vector<1x256xf32> to vector<16x256xf32>
    %43 = arith.mulf %41, %42 : vector<16x256xf32>
    %cst_26 = arith.constant dense<0.000000e+00> : vector<16xf32>
    %44 = vector.multi_reduction <add>, %43, %cst_26 [1] : vector<16x256xf32> to vector<16xf32>
    %c1_27 = arith.constant 1 : index
    %c0_28 = arith.constant 0 : index
    %45 = vector.load %arg7[%c1_27, %c0_28] : memref<2x16xf32, #tpu.memory_space<vmem>>, vector<1x16xf32>
    %46 = vector.shape_cast %45 : vector<1x16xf32> to vector<16xf32>
    %47 = vector.shape_cast %44 : vector<16xf32> to vector<1x16xf32>
    tpu.vector_store %arg7[%c1_27, %c0_28], %47 {strides = array<i32>} : memref<2x16xf32, #tpu.memory_space<vmem>>, vector<1x16xf32>,
    return
  }
  func.func @transform_0(%arg0: i32) -> (i32, i32, i32) {
    %c0_i32 = arith.constant 0 : i32
    %c0_i32_0 = arith.constant 0 : i32
    %c0_i32_1 = arith.constant 0 : i32
    return %c0_i32, %arg0, %c0_i32_0 : i32, i32, i32
  }
  func.func @transform_1(%arg0: i32) -> (i32, i32) {
    %c0_i32 = arith.constant 0 : i32
    %c0_i32_0 = arith.constant 0 : i32
    %c0_i32_1 = arith.constant 0 : i32
    return %c0_i32, %c0_i32_0 : i32, i32
  }
  func.func @transform_2(%arg0: i32) -> (i32, i32) {
    %c0_i32 = arith.constant 0 : i32
    %c0_i32_0 = arith.constant 0 : i32
    %c0_i32_1 = arith.constant 0 : i32
    return %c0_i32, %c0_i32_0 : i32, i32
  }
  func.func @transform_3(%arg0: i32) -> (i32, i32) {
    %c0_i32 = arith.constant 0 : i32
    %c0_i32_0 = arith.constant 0 : i32
    %c0_i32_1 = arith.constant 0 : i32
    return %c0_i32, %c0_i32_0 : i32, i32
  }
  func.func @transform_4(%arg0: i32) -> (i32, i32) {
    %c0_i32 = arith.constant 0 : i32
    %c0_i32_0 = arith.constant 0 : i32
    %c0_i32_1 = arith.constant 0 : i32
    return %c0_i32, %c0_i32_0 : i32, i32
  }
  func.func @transform_5(%arg0: i32) -> (i32, i32) {
    %c0_i32 = arith.constant 0 : i32
    %c0_i32_0 = arith.constant 0 : i32
    %c0_i32_1 = arith.constant 0 : i32
    return %c0_i32, %c0_i32_0 : i32, i32
  }
  func.func @transform_6(%arg0: i32) -> (i32, i32) {
    %c0_i32 = arith.constant 0 : i32
    %c0_i32_0 = arith.constant 0 : i32
    return %c0_i32, %arg0 : i32, i32
  }
}

</mosaic_0001>

<bundles_post_ra>
// kernel: tpu_custom_call.1
= control target key start
LH: loop header
LB: loop body
LE: loop exit
PB: predicated region body
PF: predicated region fallthrough
CT: control target
= control target key end

     0   :  { %11 = vsyncpa [#allocation3], 0  ;;  %s3481_s0 = inlined_call_operand.hbm [shape: bf16[2,16,512], index: 0, kind: input, shape index: {}]   ;;  %s3482_s1 = inlined_call_operand.hbm [shape: f32[2,512], index: 1, kind: input, shape index: {}]   ;;  %s3483_s2 = inlined_call_operand.hbm [shape: bf16[512,512], index: 2, kind: input, shape index: {}]   ;;  %s3484_s3 = inlined_call_operand.hbm [shape: bf16[512,256], index: 3, kind: input, shape index: {}]   ;;  %s3485_s4 = inlined_call_operand.vmem [shape: f32[1,256], index: 4, kind: input, shape index: {}]   ;;  %s3486_s5 = inlined_call_operand.vmem [shape: f32[1,256], index: 5, kind: input, shape index: {}]   ;;  %s3487_s6 = inlined_call_operand.hbm [shape: f32[2,16], index: 6, kind: output, shape index: {}]  }
   0x1   :  { %12 = vsyncpa [#allocation6], 0 }
   0x2   :  { %13 = vsyncpa [#allocation9], 0 }
   0x3   :  { %14 = vsyncpa [#allocation4], 0  ;;  %s2678_s21 = smov [#allocation5]   ;;  %s2679_s23 = smov [#allocation2]  }
   0x4   :  { %s33_s22 = sshll.u32 %s2678_s21, 4  ;;  %s20_s24 = sshll.u32 %s2679_s23, 4  ;;  %s34_s22 = int_to_ptr.vmem [resolvable:$true] %s33_s22  ;;  %s2722_s24 = int_to_ptr.vmem [resolvable:$true] %s20_s24 }
   0x5   :  { %s2560_s27 = scalar_lea.hbm %s3482_s1, 128 }
   0x6   :  { %p2561_p0 = scmp.ne.s32.totalorder %s3482_s1, %s2560_s27  ;;  %p2564_p1 = scmp.lt.u32.totalorder %s2560_s27, %s3482_s1 }
   0x8   :  { %p2566_p2 = pnand %p2564_p1, %p2561_p0 }
   0xa   :  { %2569 = shalt.err (!%p2566_p2)
}
   0xb   :  { %s2570_s8 = scalar_lea.vmem %s34_s22, 128  ;;  %p2575_p4 = scmp.lt.s32.totalorder %s34_s22, %s34_s22 }
   0xc   :  { %p2571_p3 = scmp.ne.s32.totalorder %s34_s22, %s2570_s8  ;;  %p2576_p5 = scmp.lt.s32.totalorder %s2570_s8, %s2570_s8 }
   0xe   :  { %p2577_p6 = por %p2576_p5, %p2575_p4 }
  0x10   :  { %p2578_p7 = pnand %p2577_p6, %p2571_p3 }
  0x12   :  { %2581 = shalt.err (!%p2578_p7)
}
  0x13   :  { %36 = dma.hbm_to_vmem [thread:$0]  %s3482_s1, 128, %s34_s22, [#allocation6]  }
  0x14   :  { %s2582_s13 = scalar_lea.hbm %s3481_s0, 1024 }
  0x15   :  { %p2583_p8 = scmp.ne.s32.totalorder %s3481_s0, %s2582_s13  ;;  %p2586_p9 = scmp.lt.u32.totalorder %s2582_s13, %s3481_s0 }
  0x17   :  { %p2588_p10 = pnand %p2586_p9, %p2583_p8 }
  0x19   :  { %2591 = shalt.err (!%p2588_p10)
}
  0x1a   :  { %s2592_s18 = scalar_lea.vmem %s2722_s24, 1024  ;;  %p2597_p12 = scmp.lt.s32.totalorder %s2722_s24, %s2722_s24 }
  0x1b   :  { %p2593_p11 = scmp.ne.s32.totalorder %s2722_s24, %s2592_s18  ;;  %p2598_p13 = scmp.lt.s32.totalorder %s2592_s18, %s2592_s18 }
  0x1d   :  { %p2599_p0 = por %p2598_p13, %p2597_p12 }
  0x1f   :  { %p2600_p1 = pnand %p2599_p0, %p2593_p11 }
  0x21   :  { %2603 = shalt.err (!%p2600_p1)
}
  0x22   :  { %s2680_s1 = smov 256   ;;  %s2681_s19 = smov 16  }
  0x23   :  { %26 = dma.hbm_to_vmem [thread:$0]  %s3481_s0, 1024, %s2722_s24, [#allocation3], %s2680_s1, %s2680_s1, %s2681_s19  }
  0x24   :  { %s2682_s22 = smov [#allocation7]   ;;  %s2683_s25 = smov [#allocation8]  }
  0x25   :  { %s42_s23 = sshll.u32 %s2682_s22, 4  ;;  %s54_s26 = sshll.u32 %s2683_s25, 4  ;;  %s43_s23 = int_to_ptr.vmem [resolvable:$true] %s42_s23  ;;  %s2753_s26 = int_to_ptr.vmem [resolvable:$true] %s54_s26 }
  0x26   :  { %s2604_s29 = scalar_lea.hbm %s3483_s2, 16384 }
  0x27   :  { %p2605_p2 = scmp.ne.s32.totalorder %s3483_s2, %s2604_s29  ;;  %p2608_p3 = scmp.lt.u32.totalorder %s2604_s29, %s3483_s2 }
  0x29   :  { %p2610_p4 = pnand %p2608_p3, %p2605_p2 }
  0x2b   :  { %2613 = shalt.err (!%p2610_p4)
}
  0x2c   :  { %s2614_s0 = scalar_lea.vmem %s43_s23, 16384  ;;  %p2619_p6 = scmp.lt.s32.totalorder %s43_s23, %s43_s23 }
  0x2d   :  { %p2615_p5 = scmp.ne.s32.totalorder %s43_s23, %s2614_s0  ;;  %p2620_p7 = scmp.lt.s32.totalorder %s2614_s0, %s2614_s0 }
  0x2f   :  { %p2621_p8 = por %p2620_p7, %p2619_p6 }
  0x31   :  { %p2622_p9 = pnand %p2621_p8, %p2615_p5 }
  0x33   :  { %2625 = shalt.err (!%p2622_p9)
}
  0x34   :  { %48 = dma.hbm_to_vmem [thread:$0]  %s3483_s2, 16384, %s43_s23, [#allocation6], %s2680_s1, %s2680_s1, %s2681_s19  }
  0x35   :  { %s2626_s13 = scalar_lea.hbm %s3484_s3, 8192 }
  0x36   :  { %p2627_p10 = scmp.ne.s32.totalorder %s3484_s3, %s2626_s13  ;;  %p2630_p11 = scmp.lt.u32.totalorder %s2626_s13, %s3484_s3 }
  0x38   :  { %p2632_p12 = pnand %p2630_p11, %p2627_p10 }
  0x3a   :  { %2635 = shalt.err (!%p2632_p12)
}
  0x3b   :  { %s2636_s18 = scalar_lea.vmem %s2753_s26, 8192  ;;  %p2641_p0 = scmp.lt.s32.totalorder %s2753_s26, %s2753_s26 }
  0x3c   :  { %p2637_p13 = scmp.ne.s32.totalorder %s2753_s26, %s2636_s18  ;;  %p2642_p1 = scmp.lt.s32.totalorder %s2636_s18, %s2636_s18 }
  0x3e   :  { %p2643_p2 = por %p2642_p1, %p2641_p0 }
  0x40   :  { %p2644_p3 = pnand %p2643_p2, %p2637_p13 }
  0x42   :  { %2647 = shalt.err (!%p2644_p3)
}
  0x43   :  { %s2684_s2 = smov 128   ;;  %s2685_s1 = smov 8  }
  0x44   :  { %60 = dma.hbm_to_vmem [thread:$0]  %s3484_s3, 8192, %s2753_s26, [#allocation9], %s2684_s2, %s2684_s2, %s2685_s1  }
  0x45   :  { %2670 = dma.done.wait [#allocation3], 1024  }
  0x46   :  { %2671 = vsyncadd [#allocation3], 4294966272 }
  0x47   :  { %2672 = dma.done.wait [#allocation6], 16512  }
  0x48   :  { %2673 = vsyncadd [#allocation6], 4294950784 }
  0x49   :  { %2674 = dma.done.wait [#allocation9], 8192  }
  0x4a   :  { %2675 = vsyncadd [#allocation9], 4294959104  ;;  %v2784_v0 = vld [vmem:[#allocation7 + $0x4] ss:$16 sps:$4 sm:$0xff]   ;;  %v2222_v1 = vld [vmem:[#allocation7 + $0xc] ss:$16 sps:$4 sm:$0xff]  }
  0x4b   :  { %957 = vmatprep.subr.bf16.mxu0 %v2784_v0  ;;  %v2787_v2 = vld [vmem:[#allocation7] ss:$16 sps:$4 sm:$0xff]   ;;  %v2225_v3 = vld [vmem:[#allocation7 + $0x8] ss:$16 sps:$4 sm:$0xff]   ;;  %1043 = vmatprep.subr.bf16.mxu1 %v2222_v1  ;;  %v2789_v4 = vld [vmem:[#allocation7 + $0x24] ss:$16 sps:$4 sm:$0xff]  }
  0x4c   :  { %958 = vmatpush1.bf16.msra.mxu0 %v2787_v2  ;;  %1044 = vmatpush1.bf16.msra.mxu1 %v2225_v3  ;;  %v2228_v5 = vld [vmem:[#allocation7 + $0x2c] ss:$16 sps:$4 sm:$0xff]   ;;  %v2792_v6 = vld [vmem:[#allocation7 + $0x20] ss:$16 sps:$4 sm:$0xff]   ;;  %v2231_v7 = vld [vmem:[#allocation7 + $0x28] ss:$16 sps:$4 sm:$0xff]  }
  0x4d   :  { %959 = vmatprep.subr.bf16.mxu0 %v2789_v4  ;;  %1045 = vmatprep.subr.bf16.mxu1 %v2228_v5  ;;  %v2795_v8 = vld [vmem:[#allocation7 + $0x44] ss:$16 sps:$4 sm:$0xff]   ;;  %v2234_v9 = vld [vmem:[#allocation7 + $0x4c] ss:$16 sps:$4 sm:$0xff]   ;;  %v2797_v10 = vld [vmem:[#allocation7 + $0x40] ss:$16 sps:$4 sm:$0xff]  }
  0x4e   :  { %v2237_v11 = vld [vmem:[#allocation7 + $0x48] ss:$16 sps:$4 sm:$0xff]   ;;  %v2800_v12 = vld [vmem:[#allocation7 + $0x64] ss:$16 sps:$4 sm:$0xff]   ;;  %v2240_v13 = vld [vmem:[#allocation7 + $0x6c] ss:$16 sps:$4 sm:$0xff]  }
  0x4f   :  { %v2803_v14 = vld [vmem:[#allocation7 + $0x60] ss:$16 sps:$4 sm:$0xff]   ;;  %v2243_v15 = vld [vmem:[#allocation7 + $0x68] ss:$16 sps:$4 sm:$0xff]   ;;  %v2806_v16 = vld [vmem:[#allocation7 + $0x84] ss:$16 sps:$4 sm:$0xff]  }
  0x50   :  { %960 = vmatpush1.bf16.msra.mxu0 %v2792_v6  ;;  %1046 = vmatpush1.bf16.msra.mxu1 %v2231_v7  ;;  %v2246_v17 = vld [vmem:[#allocation7 + $0x8c] ss:$16 sps:$4 sm:$0xff]   ;;  %v2809_v18 = vld [vmem:[#allocation7 + $0x80] ss:$16 sps:$4 sm:$0xff]   ;;  %v2249_v19 = vld [vmem:[#allocation7 + $0x88] ss:$16 sps:$4 sm:$0xff]  }
  0x51   :  { %961 = vmatprep.subr.bf16.mxu0 %v2795_v8  ;;  %1047 = vmatprep.subr.bf16.mxu1 %v2234_v9  ;;  %v2812_v20 = vld [vmem:[#allocation7 + $0xa4] ss:$16 sps:$4 sm:$0xff]   ;;  %v2252_v21 = vld [vmem:[#allocation7 + $0xac] ss:$16 sps:$4 sm:$0xff]   ;;  %v2815_v22 = vld [vmem:[#allocation7 + $0xa0] ss:$16 sps:$4 sm:$0xff]  }
  0x52   :  { %v2255_v23 = vld [vmem:[#allocation7 + $0xa8] ss:$16 sps:$4 sm:$0xff]   ;;  %v2818_v24 = vld [vmem:[#allocation7 + $0xc4] ss:$16 sps:$4 sm:$0xff]   ;;  %v2258_v25 = vld [vmem:[#allocation7 + $0xcc] ss:$16 sps:$4 sm:$0xff]  }
  0x53   :  { %v2821_v26 = vld [vmem:[#allocation7 + $0xc0] ss:$16 sps:$4 sm:$0xff]   ;;  %v2261_v27 = vld [vmem:[#allocation7 + $0xc8] ss:$16 sps:$4 sm:$0xff]   ;;  %v2824_v28 = vld [vmem:[#allocation7 + $0xe4] ss:$16 sps:$4 sm:$0xff]  }
  0x54   :  { %962 = vmatpush1.bf16.msra.mxu0 %v2797_v10  ;;  %1048 = vmatpush1.bf16.msra.mxu1 %v2237_v11  ;;  %v2264_v29 = vld [vmem:[#allocation7 + $0xec] ss:$16 sps:$4 sm:$0xff]   ;;  %v2827_v30 = vld [vmem:[#allocation7 + $0xe0] ss:$16 sps:$4 sm:$0xff]   ;;  %v2267_v31 = vld [vmem:[#allocation7 + $0xe8] ss:$16 sps:$4 sm:$0xff]  }
  0x55   :  { %963 = vmatprep.subr.bf16.mxu0 %v2800_v12  ;;  %1049 = vmatprep.subr.bf16.mxu1 %v2240_v13  ;;  %v2830_v32 = vld [vmem:[#allocation7 + $0x104] ss:$16 sps:$4 sm:$0xff]   ;;  %v2270_v33 = vld [vmem:[#allocation7 + $0x10c] ss:$16 sps:$4 sm:$0xff]   ;;  %v2833_v34 = vld [vmem:[#allocation7 + $0x100] ss:$16 sps:$4 sm:$0xff]  }
  0x56   :  { %v2273_v35 = vld [vmem:[#allocation7 + $0x108] ss:$16 sps:$4 sm:$0xff]   ;;  %v2836_v36 = vld [vmem:[#allocation7 + $0x124] ss:$16 sps:$4 sm:$0xff]   ;;  %v2276_v37 = vld [vmem:[#allocation7 + $0x12c] ss:$16 sps:$4 sm:$0xff]  }
  0x57   :  { %v2839_v38 = vld [vmem:[#allocation7 + $0x120] ss:$16 sps:$4 sm:$0xff]   ;;  %v2279_v39 = vld [vmem:[#allocation7 + $0x128] ss:$16 sps:$4 sm:$0xff]   ;;  %v2842_v40 = vld [vmem:[#allocation7 + $0x144] ss:$16 sps:$4 sm:$0xff]  }
  0x58   :  { %964 = vmatpush1.bf16.msra.mxu0 %v2803_v14  ;;  %1050 = vmatpush1.bf16.msra.mxu1 %v2243_v15  ;;  %v2282_v41 = vld [vmem:[#allocation7 + $0x14c] ss:$16 sps:$4 sm:$0xff]   ;;  %v2845_v42 = vld [vmem:[#allocation7 + $0x140] ss:$16 sps:$4 sm:$0xff]   ;;  %v2285_v43 = vld [vmem:[#allocation7 + $0x148] ss:$16 sps:$4 sm:$0xff]  }
  0x59   :  { %965 = vmatprep.subr.bf16.mxu0 %v2806_v16  ;;  %1051 = vmatprep.subr.bf16.mxu1 %v2246_v17  ;;  %v2848_v44 = vld [vmem:[#allocation7 + $0x164] ss:$16 sps:$4 sm:$0xff]   ;;  %v2288_v45 = vld [vmem:[#allocation7 + $0x16c] ss:$16 sps:$4 sm:$0xff]   ;;  %v2851_v46 = vld [vmem:[#allocation7 + $0x160] ss:$16 sps:$4 sm:$0xff]  }
  0x5a   :  { %v2291_v47 = vld [vmem:[#allocation7 + $0x168] ss:$16 sps:$4 sm:$0xff]   ;;  %v2318_v48 = vld [vmem:[#allocation2 + $0x4] ss:$16 sps:$4 sm:$0xff]   ;;  %v2854_v49 = vld [vmem:[#allocation7 + $0x184] ss:$16 sps:$4 sm:$0xff]  }
  0x5b   :  { %v2294_v50 = vld [vmem:[#allocation7 + $0x18c] ss:$16 sps:$4 sm:$0xff]   ;;  %989 = vmatprep.mubr.bf16.mxu0 %v2318_v48  ;;  %1075 = vmatprep.mubr.bf16.mxu1 %v2318_v48  ;;  %v2857_v51 = vld [vmem:[#allocation7 + $0x180] ss:$16 sps:$4 sm:$0xff]   ;;  %v2297_v52 = vld [vmem:[#allocation7 + $0x188] ss:$16 sps:$4 sm:$0xff]  }
  0x5c   :  { %966 = vmatpush1.bf16.msra.mxu0 %v2809_v18  ;;  %1052 = vmatpush1.bf16.msra.mxu1 %v2249_v19  ;;  %v2860_v53 = vld [vmem:[#allocation7 + $0x1a4] ss:$16 sps:$4 sm:$0xff]   ;;  %v2300_v54 = vld [vmem:[#allocation7 + $0x1ac] ss:$16 sps:$4 sm:$0xff]   ;;  %v2863_v55 = vld [vmem:[#allocation7 + $0x1a0] ss:$16 sps:$4 sm:$0xff]  }
  0x5d   :  { %967 = vmatprep.subr.bf16.mxu0 %v2812_v20  ;;  %1053 = vmatprep.subr.bf16.mxu1 %v2252_v21  ;;  %v2303_v56 = vld [vmem:[#allocation7 + $0x1a8] ss:$16 sps:$4 sm:$0xff]   ;;  %v2866_v57 = vld [vmem:[#allocation7 + $0x1c4] ss:$16 sps:$4 sm:$0xff]   ;;  %v2306_v58 = vld [vmem:[#allocation7 + $0x1cc] ss:$16 sps:$4 sm:$0xff]  }
  0x5e   :  { %v2869_v59 = vld [vmem:[#allocation7 + $0x1c0] ss:$16 sps:$4 sm:$0xff]   ;;  %v2309_v60 = vld [vmem:[#allocation7 + $0x1c8] ss:$16 sps:$4 sm:$0xff]   ;;  %v2872_v61 = vld [vmem:[#allocation7 + $0x1e4] ss:$16 sps:$4 sm:$0xff]  }
  0x5f   :  { %v2312_v62 = vld [vmem:[#allocation7 + $0x1ec] ss:$16 sps:$4 sm:$0xff]   ;;  %v2875_v63 = vld [vmem:[#allocation7 + $0x1e0] ss:$16 sps:$4 sm:$0xff]   ;;  %v2315_v1 = vld [vmem:[#allocation7 + $0x1e8] ss:$16 sps:$4 sm:$0xff]  }
  0x60   :  { %968 = vmatpush1.bf16.msra.mxu0 %v2815_v22  ;;  %1054 = vmatpush1.bf16.msra.mxu1 %v2255_v23  ;;  %v2878_v3 = vld [vmem:[#allocation7 + $0x204] ss:$16 sps:$4 sm:$0xff]   ;;  %v2324_v5 = vld [vmem:[#allocation7 + $0x20c] ss:$16 sps:$4 sm:$0xff]   ;;  %v2316_v7 = vld [vmem:[#allocation2] ss:$16 sps:$4 sm:$0xff]  }
  0x61   :  { %969 = vmatprep.subr.bf16.mxu0 %v2818_v24  ;;  %1055 = vmatprep.subr.bf16.mxu1 %v2258_v25  ;;  %v2881_v9 = vld [vmem:[#allocation7 + $0x200] ss:$16 sps:$4 sm:$0xff]   ;;  %v2322_v11 = vld [vmem:[#allocation7 + $0x208] ss:$16 sps:$4 sm:$0xff]   ;;  %v2884_v13 = vld [vmem:[#allocation7 + $0x224] ss:$16 sps:$4 sm:$0xff]  }
  0x62   :  { %v2330_v15 = vld [vmem:[#allocation7 + $0x22c] ss:$16 sps:$4 sm:$0xff]   ;;  %v2887_v17 = vld [vmem:[#allocation7 + $0x220] ss:$16 sps:$4 sm:$0xff]   ;;  %v2328_v19 = vld [vmem:[#allocation7 + $0x228] ss:$16 sps:$4 sm:$0xff]  }
  0x63   :  { %v2890_v21 = vld [vmem:[#allocation7 + $0x244] ss:$16 sps:$4 sm:$0xff]   ;;  %v2336_v23 = vld [vmem:[#allocation7 + $0x24c] ss:$16 sps:$4 sm:$0xff]   ;;  %v2893_v25 = vld [vmem:[#allocation7 + $0x240] ss:$16 sps:$4 sm:$0xff]  }
  0x64   :  { %970 = vmatpush1.bf16.msra.mxu0 %v2821_v26  ;;  %1056 = vmatpush1.bf16.msra.mxu1 %v2261_v27  ;;  %v2334_v27 = vld [vmem:[#allocation7 + $0x248] ss:$16 sps:$4 sm:$0xff]   ;;  %v2918_v48 = vld [vmem:[#allocation7 + $0x2a0] ss:$16 sps:$4 sm:$0xff]   ;;  %vm1596_vm0 = vcmask 130112   ;;  %vm1599_vm1 = vcmask 122880  }
  0x65   :  { %971 = vmatprep.subr.bf16.mxu0 %v2824_v28  ;;  %1057 = vmatprep.subr.bf16.mxu1 %v2264_v29  ;;  %v2896_v29 = vld [vmem:[#allocation7 + $0x264] ss:$16 sps:$4 sm:$0xff]  }
  0x68   :  { %972 = vmatpush1.bf16.msra.mxu0 %v2827_v30  ;;  %1058 = vmatpush1.bf16.msra.mxu1 %v2267_v31  ;;  %v2342_v31 = vld [vmem:[#allocation7 + $0x26c] ss:$16 sps:$4 sm:$0xff]  }
  0x69   :  { %973 = vmatprep.subr.bf16.mxu0 %v2830_v32  ;;  %1059 = vmatprep.subr.bf16.mxu1 %v2270_v33  ;;  %v2899_v33 = vld [vmem:[#allocation7 + $0x260] ss:$16 sps:$4 sm:$0xff]  }
  0x6c   :  { %974 = vmatpush1.bf16.msra.mxu0 %v2833_v34  ;;  %1060 = vmatpush1.bf16.msra.mxu1 %v2273_v35  ;;  %v2340_v35 = vld [vmem:[#allocation7 + $0x268] ss:$16 sps:$4 sm:$0xff]  }
  0x6d   :  { %975 = vmatprep.subr.bf16.mxu0 %v2836_v36  ;;  %1061 = vmatprep.subr.bf16.mxu1 %v2276_v37  ;;  %v2902_v37 = vld [vmem:[#allocation7 + $0x284] ss:$16 sps:$4 sm:$0xff]  }
  0x70   :  { %976 = vmatpush1.bf16.msra.mxu0 %v2839_v38  ;;  %1062 = vmatpush1.bf16.msra.mxu1 %v2279_v39  ;;  %v2905_v39 = vld [vmem:[#allocation7 + $0x28c] ss:$16 sps:$4 sm:$0xff]  }
  0x71   :  { %977 = vmatprep.subr.bf16.mxu0 %v2842_v40  ;;  %1063 = vmatprep.subr.bf16.mxu1 %v2282_v41  ;;  %3518 = vst [vmem:[#allocation15_spill] sm:$0xff] %v2905_v39  ;;  %v2907_v41 = vld [vmem:[#allocation7 + $0x280] ss:$16 sps:$4 sm:$0xff]  }
  0x74   :  { %978 = vmatpush1.bf16.msra.mxu0 %v2845_v42  ;;  %1064 = vmatpush1.bf16.msra.mxu1 %v2285_v43  ;;  %v2909_v43 = vld [vmem:[#allocation7 + $0x288] ss:$16 sps:$4 sm:$0xff]  }
  0x75   :  { %979 = vmatprep.subr.bf16.mxu0 %v2848_v44  ;;  %1065 = vmatprep.subr.bf16.mxu1 %v2288_v45  ;;  %3519 = vst [vmem:[#allocation16_spill] sm:$0xff] %v2909_v43  ;;  %v2912_v45 = vld [vmem:[#allocation7 + $0x2a4] ss:$16 sps:$4 sm:$0xff]  }
  0x78   :  { %980 = vmatpush1.bf16.msra.mxu0 %v2851_v46  ;;  %1066 = vmatpush1.bf16.msra.mxu1 %v2291_v47  ;;  %v2916_v47 = vld [vmem:[#allocation7 + $0x2ac] ss:$16 sps:$4 sm:$0xff]  }
  0x79   :  { %981 = vmatprep.subr.bf16.mxu0 %v2854_v49  ;;  %1067 = vmatprep.subr.bf16.mxu1 %v2294_v50  ;;  %3520 = vst [vmem:[#allocation17_spill] sm:$0xff] %v2916_v47  ;;  %v2920_v50 = vld [vmem:[#allocation7 + $0x2a8] ss:$16 sps:$4 sm:$0xff]  }
  0x7a   :  { %3521 = vst [vmem:[#allocation18_spill] sm:$0xff] %v2920_v50 }
  0x7c   :  { %982 = vmatpush1.bf16.msra.mxu0 %v2857_v51  ;;  %1068 = vmatpush1.bf16.msra.mxu1 %v2297_v52  ;;  %v2924_v52 = vld [vmem:[#allocation7 + $0x2c4] ss:$16 sps:$4 sm:$0xff]  }
  0x7d   :  { %983 = vmatprep.subr.bf16.mxu0 %v2860_v53  ;;  %1069 = vmatprep.subr.bf16.mxu1 %v2300_v54  ;;  %v2928_v54 = vld [vmem:[#allocation7 + $0x2cc] ss:$16 sps:$4 sm:$0xff]  }
  0x7e   :  { %3522 = vst [vmem:[#allocation19_spill] sm:$0xff] %v2928_v54 }
  0x80   :  { %984 = vmatpush1.bf16.msra.mxu0 %v2863_v55  ;;  %1070 = vmatpush1.bf16.msra.mxu1 %v2303_v56  ;;  %v2930_v56 = vld [vmem:[#allocation7 + $0x2c0] ss:$16 sps:$4 sm:$0xff]  }
  0x81   :  { %985 = vmatprep.subr.bf16.mxu0 %v2866_v57  ;;  %1071 = vmatprep.subr.bf16.mxu1 %v2306_v58  ;;  %v2932_v58 = vld [vmem:[#allocation7 + $0x2c8] ss:$16 sps:$4 sm:$0xff]  }
  0x82   :  { %3523 = vst [vmem:[#allocation20_spill] sm:$0xff] %v2932_v58 }
  0x84   :  { %986 = vmatpush1.bf16.msra.mxu0 %v2869_v59  ;;  %1072 = vmatpush1.bf16.msra.mxu1 %v2309_v60  ;;  %v2417_v60 = vld [vmem:[#allocation2 + $0xc] ss:$16 sps:$4 sm:$0xff]  }
  0x85   :  { %987 = vmatprep.subr.bf16.mxu0 %v2872_v61  ;;  %1073 = vmatprep.subr.bf16.mxu1 %v2312_v62  ;;  %v2936_v62 = vld [vmem:[#allocation7 + $0x2e4] ss:$16 sps:$4 sm:$0xff]  }
  0x88   :  { %988 = vmatpush1.bf16.msra.mxu0 %v2875_v63  ;;  %1074 = vmatpush1.bf16.msra.mxu1 %v2315_v1  ;;  %v2940_v1 = vld [vmem:[#allocation7 + $0x2ec] ss:$16 sps:$4 sm:$0xff]  }
  0x89   :  { %1000 = vmatprep.subr.bf16.mxu0 %v2878_v3  ;;  %1086 = vmatprep.subr.bf16.mxu1 %v2324_v5  ;;  %3524 = vst [vmem:[#allocation21_spill] sm:$0xff] %v2940_v1  ;;  %v2942_v5 = vld [vmem:[#allocation7 + $0x2e0] ss:$16 sps:$4 sm:$0xff]  }
  0x8b   :  { %990 = vmatmul.mubr.bf16.vlgmr.msra.gmra.mrb[0].mxu0 %v2316_v7  ;;  %1076 = vmatmul.mubr.bf16.vlgmr.msra.gmra.mrb[0].mxu1 %v2316_v7  ;;  %v2944_v7 = vld [vmem:[#allocation7 + $0x2e8] ss:$16 sps:$4 sm:$0xff]  }
  0x8c   :  { %1001 = vmatpush1.bf16.msra.mxu0 %v2881_v9  ;;  %1087 = vmatpush1.bf16.msra.mxu1 %v2322_v11  ;;  %3525 = vst [vmem:[#allocation22_spill] sm:$0xff] %v2944_v7  ;;  %v2948_v11 = vld [vmem:[#allocation7 + $0x304] ss:$16 sps:$4 sm:$0xff]  }
  0x8d   :  { %1002 = vmatprep.subr.bf16.mxu0 %v2884_v13  ;;  %1088 = vmatprep.subr.bf16.mxu1 %v2330_v15  ;;  %v2952_v15 = vld [vmem:[#allocation7 + $0x30c] ss:$16 sps:$4 sm:$0xff]  }
  0x8e   :  { %1032 = vmatprep.mubr.bf16.mxu0 %v2417_v60  ;;  %1118 = vmatprep.mubr.bf16.mxu1 %v2417_v60  ;;  %3526 = vst [vmem:[#allocation23_spill] sm:$0xff] %v2952_v15  ;;  %v2968_v60 = vld [vmem:[#allocation7 + $0x328] ss:$16 sps:$4 sm:$0xff]  }
  0x8f   :  { %3529 = vst [vmem:[#allocation26_spill] sm:$0xff] %v2968_v60 }
  0x90   :  { %1003 = vmatpush1.bf16.msra.mxu0 %v2887_v17  ;;  %1089 = vmatpush1.bf16.msra.mxu1 %v2328_v19  ;;  %v2954_v19 = vld [vmem:[#allocation7 + $0x300] ss:$16 sps:$4 sm:$0xff]  }
  0x91   :  { %1004 = vmatprep.subr.bf16.mxu0 %v2890_v21  ;;  %1090 = vmatprep.subr.bf16.mxu1 %v2336_v23  ;;  %v2956_v23 = vld [vmem:[#allocation7 + $0x308] ss:$16 sps:$4 sm:$0xff]  }
  0x92   :  { %3527 = vst [vmem:[#allocation24_spill] sm:$0xff] %v2956_v23 }
  0x94   :  { %1005 = vmatpush1.bf16.msra.mxu0 %v2893_v25  ;;  %1091 = vmatpush1.bf16.msra.mxu1 %v2334_v27  ;;  %v2960_v27 = vld [vmem:[#allocation7 + $0x324] ss:$16 sps:$4 sm:$0xff]  }
  0x95   :  { %1006 = vmatprep.subr.bf16.mxu0 %v2896_v29  ;;  %1092 = vmatprep.subr.bf16.mxu1 %v2342_v31  ;;  %v2964_v31 = vld [vmem:[#allocation7 + $0x32c] ss:$16 sps:$4 sm:$0xff]  }
  0x96   :  { %3528 = vst [vmem:[#allocation25_spill] sm:$0xff] %v2964_v31 }
  0x98   :  { %1007 = vmatpush1.bf16.msra.mxu0 %v2899_v33  ;;  %1093 = vmatpush1.bf16.msra.mxu1 %v2340_v35  ;;  %v2966_v35 = vld [vmem:[#allocation7 + $0x320] ss:$16 sps:$4 sm:$0xff]  }
  0x99   :  { %1008 = vmatprep.subr.bf16.mxu0 %v2902_v37  ;;  %1094 = vmatprep.subr.bf16.mxu1 %v2905_v39  ;;  %v3006_v39 = vld [vmem:[#allocation7 + $0x3a4] ss:$16 sps:$4 sm:$0xff]  }
  0x9c   :  { %1009 = vmatpush1.bf16.msra.mxu0 %v2907_v41  ;;  %1095 = vmatpush1.bf16.msra.mxu1 %v2909_v43  ;;  %v2996_v43 = vld [vmem:[#allocation7 + $0x38c] ss:$16 sps:$4 sm:$0xff]  }
  0x9d   :  { %1010 = vmatprep.subr.bf16.mxu0 %v2912_v45  ;;  %1096 = vmatprep.subr.bf16.mxu1 %v2916_v47  ;;  %v2994_v47 = vld [vmem:[#allocation7 + $0x384] ss:$16 sps:$4 sm:$0xff]   ;;  %3538 = vst [vmem:[#allocation35_spill] sm:$0xff] %v2996_v43 }
  0x9e   :  { %3537 = vst [vmem:[#allocation34_spill] sm:$0xff] %v2994_v47 }
  0xa0   :  { %1011 = vmatpush1.bf16.msra.mxu0 %v2918_v48  ;;  %1097 = vmatpush1.bf16.msra.mxu1 %v2920_v50  ;;  %v2990_v50 = vld [vmem:[#allocation7 + $0x360] ss:$16 sps:$4 sm:$0xff]  }
  0xa1   :  { %1012 = vmatprep.subr.bf16.mxu0 %v2924_v52  ;;  %1098 = vmatprep.subr.bf16.mxu1 %v2928_v54  ;;  %v2984_v54 = vld [vmem:[#allocation7 + $0x364] ss:$16 sps:$4 sm:$0xff]  }
  0xa2   :  { %3534 = vst [vmem:[#allocation31_spill] sm:$0xff] %v2984_v54 }
  0xa4   :  { %1013 = vmatpush1.bf16.msra.mxu0 %v2930_v56  ;;  %1099 = vmatpush1.bf16.msra.mxu1 %v2932_v58  ;;  %v2978_v58 = vld [vmem:[#allocation7 + $0x340] ss:$16 sps:$4 sm:$0xff]  }
  0xa5   :  { %1014 = vmatprep.subr.bf16.mxu0 %v2936_v62  ;;  %1100 = vmatprep.subr.bf16.mxu1 %v2940_v1  ;;  %v2972_v1 = vld [vmem:[#allocation7 + $0x344] ss:$16 sps:$4 sm:$0xff]   ;;  %3532 = vst [vmem:[#allocation29_spill] sm:$0xff] %v2978_v58 }
  0xa6   :  { %3530 = vst [vmem:[#allocation27_spill] sm:$0xff] %v2972_v1 }
  0xa8   :  { %1015 = vmatpush1.bf16.msra.mxu0 %v2942_v5  ;;  %1101 = vmatpush1.bf16.msra.mxu1 %v2944_v7  ;;  %v2976_v7 = vld [vmem:[#allocation7 + $0x34c] ss:$16 sps:$4 sm:$0xff]  }
  0xa9   :  { %1016 = vmatprep.subr.bf16.mxu0 %v2948_v11  ;;  %1102 = vmatprep.subr.bf16.mxu1 %v2952_v15  ;;  %3531 = vst [vmem:[#allocation28_spill] sm:$0xff] %v2976_v7  ;;  %v2980_v15 = vld [vmem:[#allocation7 + $0x348] ss:$16 sps:$4 sm:$0xff]  }
  0xaa   :  { %3533 = vst [vmem:[#allocation30_spill] sm:$0xff] %v2980_v15 }
  0xac   :  { %1017 = vmatpush1.bf16.msra.mxu0 %v2954_v19  ;;  %1103 = vmatpush1.bf16.msra.mxu1 %v2956_v23  ;;  %v2988_v23 = vld [vmem:[#allocation7 + $0x36c] ss:$16 sps:$4 sm:$0xff]  }
  0xad   :  { %1018 = vmatprep.subr.bf16.mxu0 %v2960_v27  ;;  %1104 = vmatprep.subr.bf16.mxu1 %v2964_v31  ;;  %3535 = vst [vmem:[#allocation32_spill] sm:$0xff] %v2988_v23  ;;  %v2992_v31 = vld [vmem:[#allocation7 + $0x368] ss:$16 sps:$4 sm:$0xff]  }
  0xae   :  { %3536 = vst [vmem:[#allocation33_spill] sm:$0xff] %v2992_v31 }
  0xb0   :  { %1019 = vmatpush1.bf16.msra.mxu0 %v2966_v35  ;;  %1105 = vmatpush1.bf16.msra.mxu1 %v2968_v60  ;;  %v3002_v60 = vld [vmem:[#allocation7 + $0x380] ss:$16 sps:$4 sm:$0xff]  }
  0xb1   :  { %1020 = vmatprep.subr.bf16.mxu0 %v2972_v1  ;;  %1106 = vmatprep.subr.bf16.mxu1 %v2976_v7  ;;  %3539 = vst [vmem:[#allocation36_spill] sm:$0xff] %v3002_v60  ;;  %v3004_v7 = vld [vmem:[#allocation7 + $0x388] ss:$16 sps:$4 sm:$0xff]   ;;  %v3008_v1 = vld [vmem:[#allocation7 + $0x3ac] ss:$16 sps:$4 sm:$0xff]  }
  0xb2   :  { %3540 = vst [vmem:[#allocation37_spill] sm:$0xff] %v3004_v7  ;;  %3541 = vst [vmem:[#allocation38_spill] sm:$0xff] %v3008_v1 }
  0xb4   :  { %1021 = vmatpush1.bf16.msra.mxu0 %v2978_v58  ;;  %1107 = vmatpush1.bf16.msra.mxu1 %v2980_v15  ;;  %v3014_v15 = vld [vmem:[#allocation7 + $0x3a0] ss:$16 sps:$4 sm:$0xff]   ;;  %v3020_v58 = vld [vmem:[#allocation7 + $0x3cc] ss:$16 sps:$4 sm:$0xff]  }
  0xb5   :  { %1022 = vmatprep.subr.bf16.mxu0 %v2984_v54  ;;  %1108 = vmatprep.subr.bf16.mxu1 %v2988_v23  ;;  %v3016_v54 = vld [vmem:[#allocation7 + $0x3a8] ss:$16 sps:$4 sm:$0xff]   ;;  %v3018_v23 = vld [vmem:[#allocation7 + $0x3c4] ss:$16 sps:$4 sm:$0xff]   ;;  %3544 = vst [vmem:[#allocation41_spill] sm:$0xff] %v3020_v58 }
  0xb6   :  { %3542 = vst [vmem:[#allocation39_spill] sm:$0xff] %v3016_v54  ;;  %3543 = vst [vmem:[#allocation40_spill] sm:$0xff] %v3018_v23 }
  0xb8   :  { %1023 = vmatpush1.bf16.msra.mxu0 %v2990_v50  ;;  %1109 = vmatpush1.bf16.msra.mxu1 %v2992_v31  ;;  %v3030_v31 = vld [vmem:[#allocation7 + $0x3c8] ss:$16 sps:$4 sm:$0xff]  }
  0xb9   :  { %1024 = vmatprep.subr.bf16.mxu0 %v2994_v47  ;;  %1110 = vmatprep.subr.bf16.mxu1 %v2996_v43  ;;  %v3028_v43 = vld [vmem:[#allocation7 + $0x3c0] ss:$16 sps:$4 sm:$0xff]   ;;  %3545 = vst [vmem:[#allocation42_spill] sm:$0xff] %v3030_v31  ;;  %v3034_v47 = vld [vmem:[#allocation7 + $0x3e4] ss:$16 sps:$4 sm:$0xff]  }
  0xbc   :  { %1025 = vmatpush1.bf16.msra.mxu0 %v3002_v60  ;;  %1111 = vmatpush1.bf16.msra.mxu1 %v3004_v7  ;;  %v3036_v60 = vld [vmem:[#allocation7 + $0x3ec] ss:$16 sps:$4 sm:$0xff]   ;;  %v3042_v7 = vld [vmem:[#allocation7 + $0x3e8] ss:$16 sps:$4 sm:$0xff]  }
  0xbd   :  { %1026 = vmatprep.subr.bf16.mxu0 %v3006_v39  ;;  %1112 = vmatprep.subr.bf16.mxu1 %v3008_v1  ;;  %3546 = vst [vmem:[#allocation43_spill] sm:$0xff] %v3036_v60  ;;  %v3040_v1 = vld [vmem:[#allocation7 + $0x3e0] ss:$16 sps:$4 sm:$0xff]   ;;  %3547 = vst [vmem:[#allocation44_spill] sm:$0xff] %v3042_v7 }
  0xc0   :  { %1027 = vmatpush1.bf16.msra.mxu0 %v3014_v15  ;;  %1113 = vmatpush1.bf16.msra.mxu1 %v3016_v54  ;;  %v3046_v54 = vld [vmem:[#allocation8 + $0x4] ss:$8 sps:$4 sm:$0xff]  }
  0xc1   :  { %1028 = vmatprep.subr.bf16.mxu0 %v3018_v23  ;;  %1114 = vmatprep.subr.bf16.mxu1 %v3020_v58  ;;  %v2415_v23 = vld [vmem:[#allocation2 + $0x8] ss:$16 sps:$4 sm:$0xff]  }
  0xc2   :  { %v3050_v58 = vld [vmem:[#allocation8] ss:$8 sps:$4 sm:$0xff]  }
  0xc4   :  { %1029 = vmatpush1.bf16.msra.mxu0 %v3028_v43  ;;  %1115 = vmatpush1.bf16.msra.mxu1 %v3030_v31  ;;  %v3054_v31 = vld [vmem:[#allocation8 + $0x14] ss:$8 sps:$4 sm:$0xff]  }
  0xc5   :  { %1030 = vmatprep.subr.bf16.mxu0 %v3034_v47  ;;  %1116 = vmatprep.subr.bf16.mxu1 %v3036_v60  ;;  %v3058_v60 = vld [vmem:[#allocation8 + $0x10] ss:$8 sps:$4 sm:$0xff]  }
  0xc8   :  { %1031 = vmatpush1.bf16.msra.mxu0 %v3040_v1  ;;  %1117 = vmatpush1.bf16.msra.mxu1 %v3042_v7  ;;  %v3062_v7 = vld [vmem:[#allocation8 + $0x24] ss:$8 sps:$4 sm:$0xff]  }
  0xc9   :  { %1649 = vmatprep.subr.bf16.mxu1 %v2784_v0  ;;  %1472 = vmatprep.subr.bf16.mxu0 %v3046_v54  ;;  %v3066_v0 = vld [vmem:[#allocation8 + $0x20] ss:$8 sps:$4 sm:$0xff]  }
  0xcb   :  { %1033 = vmatmul.mubr.bf16.vlgmr.msra.gmra.mrb[0].mxu0 %v2415_v23  ;;  %1119 = vmatmul.mubr.bf16.vlgmr.msra.gmra.mrb[0].mxu1 %v2415_v23 }
  0xcc   :  { %1650 = vmatpush1.bf16.msra.mxu1 %v2787_v2  ;;  %1473 = vmatpush1.bf16.msra.mxu0 %v3050_v58  ;;  %v3070_v2 = vld [vmem:[#allocation8 + $0x34] ss:$8 sps:$4 sm:$0xff]  }
  0xcd   :  { %1651 = vmatprep.subr.bf16.mxu1 %v2789_v4  ;;  %1474 = vmatprep.subr.bf16.mxu0 %v3054_v31  ;;  %v3074_v4 = vld [vmem:[#allocation8 + $0x30] ss:$8 sps:$4 sm:$0xff]  }
  0xd0   :  { %1652 = vmatpush1.bf16.msra.mxu1 %v2792_v6  ;;  %1475 = vmatpush1.bf16.msra.mxu0 %v3058_v60  ;;  %v3078_v6 = vld [vmem:[#allocation8 + $0x44] ss:$8 sps:$4 sm:$0xff]  }
  0xd1   :  { %1653 = vmatprep.subr.bf16.mxu1 %v2795_v8  ;;  %1476 = vmatprep.subr.bf16.mxu0 %v3062_v7  ;;  %v3082_v8 = vld [vmem:[#allocation8 + $0x40] ss:$8 sps:$4 sm:$0xff]  }
  0xd4   :  { %1654 = vmatpush1.bf16.msra.mxu1 %v2797_v10  ;;  %1477 = vmatpush1.bf16.msra.mxu0 %v3066_v0  ;;  %v3086_v10 = vld [vmem:[#allocation8 + $0x54] ss:$8 sps:$4 sm:$0xff]  }
  0xd5   :  { %1655 = vmatprep.subr.bf16.mxu1 %v2800_v12  ;;  %1478 = vmatprep.subr.bf16.mxu0 %v3070_v2  ;;  %v3090_v12 = vld [vmem:[#allocation8 + $0x50] ss:$8 sps:$4 sm:$0xff]  }
  0xd8   :  { %1656 = vmatpush1.bf16.msra.mxu1 %v2803_v14  ;;  %1479 = vmatpush1.bf16.msra.mxu0 %v3074_v4  ;;  %v3094_v14 = vld [vmem:[#allocation8 + $0x64] ss:$8 sps:$4 sm:$0xff]  }
  0xd9   :  { %1657 = vmatprep.subr.bf16.mxu1 %v2806_v16  ;;  %1480 = vmatprep.subr.bf16.mxu0 %v3078_v6  ;;  %v3098_v16 = vld [vmem:[#allocation8 + $0x60] ss:$8 sps:$4 sm:$0xff]  }
  0xdc   :  { %1658 = vmatpush1.bf16.msra.mxu1 %v2809_v18  ;;  %1481 = vmatpush1.bf16.msra.mxu0 %v3082_v8  ;;  %v3102_v18 = vld [vmem:[#allocation8 + $0x74] ss:$8 sps:$4 sm:$0xff]  }
  0xdd   :  { %1659 = vmatprep.subr.bf16.mxu1 %v2812_v20  ;;  %1482 = vmatprep.subr.bf16.mxu0 %v3086_v10  ;;  %v3106_v20 = vld [vmem:[#allocation8 + $0x70] ss:$8 sps:$4 sm:$0xff]  }
  0xe0   :  { %1660 = vmatpush1.bf16.msra.mxu1 %v2815_v22  ;;  %1483 = vmatpush1.bf16.msra.mxu0 %v3090_v12  ;;  %v3110_v22 = vld [vmem:[#allocation8 + $0x84] ss:$8 sps:$4 sm:$0xff]  }
  0xe1   :  { %1661 = vmatprep.subr.bf16.mxu1 %v2818_v24  ;;  %1484 = vmatprep.subr.bf16.mxu0 %v3094_v14  ;;  %v3114_v24 = vld [vmem:[#allocation8 + $0x80] ss:$8 sps:$4 sm:$0xff]  }
  0xe4   :  { %1662 = vmatpush1.bf16.msra.mxu1 %v2821_v26  ;;  %1485 = vmatpush1.bf16.msra.mxu0 %v3098_v16  ;;  %v3118_v26 = vld [vmem:[#allocation8 + $0x94] ss:$8 sps:$4 sm:$0xff]  }
  0xe5   :  { %1663 = vmatprep.subr.bf16.mxu1 %v2824_v28  ;;  %1486 = vmatprep.subr.bf16.mxu0 %v3102_v18  ;;  %v3122_v28 = vld [vmem:[#allocation8 + $0x90] ss:$8 sps:$4 sm:$0xff]  }
  0xe8   :  { %1664 = vmatpush1.bf16.msra.mxu1 %v2827_v30  ;;  %1487 = vmatpush1.bf16.msra.mxu0 %v3106_v20  ;;  %v3126_v30 = vld [vmem:[#allocation8 + $0xa4] ss:$8 sps:$4 sm:$0xff]  }
  0xe9   :  { %1665 = vmatprep.subr.bf16.mxu1 %v2830_v32  ;;  %1488 = vmatprep.subr.bf16.mxu0 %v3110_v22  ;;  %v3130_v32 = vld [vmem:[#allocation8 + $0xa0] ss:$8 sps:$4 sm:$0xff]  }
  0xec   :  { %1666 = vmatpush1.bf16.msra.mxu1 %v2833_v34  ;;  %1489 = vmatpush1.bf16.msra.mxu0 %v3114_v24  ;;  %v3134_v34 = vld [vmem:[#allocation8 + $0xb4] ss:$8 sps:$4 sm:$0xff]  }
  0xed   :  { %1667 = vmatprep.subr.bf16.mxu1 %v2836_v36  ;;  %1490 = vmatprep.subr.bf16.mxu0 %v3118_v26  ;;  %v3138_v36 = vld [vmem:[#allocation8 + $0xb0] ss:$8 sps:$4 sm:$0xff]  }
  0xf0   :  { %1668 = vmatpush1.bf16.msra.mxu1 %v2839_v38  ;;  %1491 = vmatpush1.bf16.msra.mxu0 %v3122_v28  ;;  %v3142_v38 = vld [vmem:[#allocation8 + $0xc4] ss:$8 sps:$4 sm:$0xff]  }
  0xf1   :  { %1669 = vmatprep.subr.bf16.mxu1 %v2842_v40  ;;  %1492 = vmatprep.subr.bf16.mxu0 %v3126_v30  ;;  %v3146_v40 = vld [vmem:[#allocation8 + $0xc0] ss:$8 sps:$4 sm:$0xff]  }
  0xf4   :  { %1670 = vmatpush1.bf16.msra.mxu1 %v2845_v42  ;;  %1493 = vmatpush1.bf16.msra.mxu0 %v3130_v32  ;;  %v3150_v42 = vld [vmem:[#allocation8 + $0xd4] ss:$8 sps:$4 sm:$0xff]  }
  0xf5   :  { %1671 = vmatprep.subr.bf16.mxu1 %v2848_v44  ;;  %1494 = vmatprep.subr.bf16.mxu0 %v3134_v34  ;;  %v3154_v44 = vld [vmem:[#allocation8 + $0xd0] ss:$8 sps:$4 sm:$0xff]  }
  0xf8   :  { %1672 = vmatpush1.bf16.msra.mxu1 %v2851_v46  ;;  %1495 = vmatpush1.bf16.msra.mxu0 %v3138_v36  ;;  %v3165_v46 = vld [vmem:[#allocation8 + $0xe4] ss:$8 sps:$4 sm:$0xff]  }
  0xf9   :  { %1673 = vmatprep.subr.bf16.mxu1 %v2854_v49  ;;  %1496 = vmatprep.subr.bf16.mxu0 %v3142_v38  ;;  %v3167_v49 = vld [vmem:[#allocation8 + $0xe0] ss:$8 sps:$4 sm:$0xff]  }
  0xfc   :  { %1674 = vmatpush1.bf16.msra.mxu1 %v2857_v51  ;;  %1497 = vmatpush1.bf16.msra.mxu0 %v3146_v40  ;;  %v3171_v51 = vld [vmem:[#allocation8 + $0xf4] ss:$8 sps:$4 sm:$0xff]  }
  0xfd   :  { %1675 = vmatprep.subr.bf16.mxu1 %v2860_v53  ;;  %1498 = vmatprep.subr.bf16.mxu0 %v3150_v42  ;;  %v3173_v53 = vld [vmem:[#allocation8 + $0xf0] ss:$8 sps:$4 sm:$0xff]  }
 0x100   :  { %1676 = vmatpush1.bf16.msra.mxu1 %v2863_v55  ;;  %1499 = vmatpush1.bf16.msra.mxu0 %v3154_v44  ;;  %v3176_v55 = vld [vmem:[#allocation2 + $0x24] ss:$16 sps:$4 sm:$0xff]  }
 0x101   :  { %1677 = vmatprep.subr.bf16.mxu1 %v2866_v57  ;;  %1500 = vmatprep.subr.bf16.mxu0 %v3165_v46  ;;  %v3179_v57 = vld [vmem:[#allocation2 + $0x20] ss:$16 sps:$4 sm:$0xff]  }
 0x102   :  { %1681 = vmatprep.mubr.bf16.mxu1 %v3176_v55 }
 0x104   :  { %1678 = vmatpush1.bf16.msra.mxu1 %v2869_v59  ;;  %1501 = vmatpush1.bf16.msra.mxu0 %v3167_v49  ;;  %v3182_v59 = vld [vmem:[#allocation8 + $0x104] ss:$8 sps:$4 sm:$0xff]  }
 0x105   :  { %1679 = vmatprep.subr.bf16.mxu1 %v2872_v61  ;;  %1502 = vmatprep.subr.bf16.mxu0 %v3171_v51  ;;  %v3548_v61 = vld [vmem:[#allocation27_spill] sm:$0xff] }
 0x108   :  { %1680 = vmatpush1.bf16.msra.mxu1 %v2875_v63  ;;  %1503 = vmatpush1.bf16.msra.mxu0 %v3173_v53  ;;  %v3549_v63 = vld [vmem:[#allocation29_spill] sm:$0xff] }
 0x109   :  { %1692 = vmatprep.subr.bf16.mxu1 %v2878_v3  ;;  %1515 = vmatprep.subr.bf16.mxu0 %v3182_v59  ;;  %v3550_v3 = vld [vmem:[#allocation31_spill] sm:$0xff] }
 0x10b   :  { %1682 = vmatmul.mubr.bf16.vlgmr.msra.gmra.mrb[4].mxu1 %v3179_v57 }
 0x10c   :  { %1693 = vmatpush1.bf16.msra.mxu1 %v2881_v9  ;;  %v3551_v9 = vld [vmem:[#allocation34_spill] sm:$0xff] }
 0x10d   :  { %1694 = vmatprep.subr.bf16.mxu1 %v2884_v13  ;;  %v3552_v13 = vld [vmem:[#allocation36_spill] sm:$0xff] }
 0x110   :  { %1695 = vmatpush1.bf16.msra.mxu1 %v2887_v17  ;;  %v3553_v17 = vld [vmem:[#allocation40_spill] sm:$0xff] }
 0x111   :  { %1696 = vmatprep.subr.bf16.mxu1 %v2890_v21  ;;  %v3217_v21 = vld [vmem:[#allocation2 + $0x2c] ss:$16 sps:$4 sm:$0xff]  }
 0x112   :  { %1724 = vmatprep.mubr.bf16.mxu1 %v3217_v21 }
 0x114   :  { %1697 = vmatpush1.bf16.msra.mxu1 %v2893_v25  ;;  %v3219_v25 = vld [vmem:[#allocation2 + $0x28] ss:$16 sps:$4 sm:$0xff]  }
 0x115   :  { %1698 = vmatprep.subr.bf16.mxu1 %v2896_v29  ;;  %v277_v29 = vlaneseq }
 0x118   :  { %1699 = vmatpush1.bf16.msra.mxu1 %v2899_v33  ;;  %v3247_v33 = vshrl.u32 %v277_v29, 7 }
 0x119   :  { %1700 = vmatprep.subr.bf16.mxu1 %v2902_v37 }
 0x11a   :  { %v3252_v37 = vsub.s32 0, %v3247_v33 }
 0x11c   :  { %1701 = vmatpush1.bf16.msra.mxu1 %v2907_v41  ;;  %v275_v41 = vld [vmem:[#allocation5] ss:$2 sm:$0xf] }
 0x11d   :  { %1702 = vmatprep.subr.bf16.mxu1 %v2912_v45  ;;  %v291_v45 = vsub.s32 3, %v3247_v33 }
 0x120   :  { %1703 = vmatpush1.bf16.msra.mxu1 %v2918_v48 }
 0x121   :  { %1704 = vmatprep.subr.bf16.mxu1 %v2924_v52  ;;  %v292_v52 = vrot.slane %v275_v41, %v291_v45 }
 0x124   :  { %1705 = vmatpush1.bf16.msra.mxu1 %v2930_v56 }
 0x125   :  { %1706 = vmatprep.subr.bf16.mxu1 %v2936_v62 }
 0x128   :  { %1707 = vmatpush1.bf16.msra.mxu1 %v2942_v5 }
 0x129   :  { %1708 = vmatprep.subr.bf16.mxu1 %v2948_v11 }
 0x12c   :  { %1709 = vmatpush1.bf16.msra.mxu1 %v2954_v19 }
 0x12d   :  { %1710 = vmatprep.subr.bf16.mxu1 %v2960_v27 }
 0x130   :  { %1711 = vmatpush1.bf16.msra.mxu1 %v2966_v35 }
 0x131   :  { %1712 = vmatprep.subr.bf16.mxu1 %v3548_v61  ;;  %v3319_v61 = vld [vmem:[#allocation8 + $0x184] ss:$8 sps:$4 sm:$0xff]  }
 0x134   :  { %1713 = vmatpush1.bf16.msra.mxu1 %v3549_v63  ;;  %v3322_v63 = vld [vmem:[#allocation8 + $0x180] ss:$8 sps:$4 sm:$0xff]  }
 0x135   :  { %1714 = vmatprep.subr.bf16.mxu1 %v3550_v3  ;;  %v3325_v3 = vld [vmem:[#allocation8 + $0x194] ss:$8 sps:$4 sm:$0xff]  }
 0x138   :  { %1715 = vmatpush1.bf16.msra.mxu1 %v2990_v50 }
 0x139   :  { %1716 = vmatprep.subr.bf16.mxu1 %v3551_v9  ;;  %v3328_v9 = vld [vmem:[#allocation8 + $0x190] ss:$8 sps:$4 sm:$0xff]  }
 0x13c   :  { %1717 = vmatpush1.bf16.msra.mxu1 %v3552_v13  ;;  %v3331_v13 = vld [vmem:[#allocation8 + $0x1a4] ss:$8 sps:$4 sm:$0xff]  }
 0x13d   :  { %1718 = vmatprep.subr.bf16.mxu1 %v3006_v39  ;;  %v287_v39 = vsub.s32 2, %v3247_v33 }
 0x13f   :  { %v288_v48 = vrot.slane %v275_v41, %v287_v39 }
 0x140   :  { %1719 = vmatpush1.bf16.msra.mxu1 %v3014_v15 }
 0x141   :  { %1720 = vmatprep.subr.bf16.mxu1 %v3553_v17  ;;  %v3334_v17 = vld [vmem:[#allocation8 + $0x1a0] ss:$8 sps:$4 sm:$0xff]  }
 0x144   :  { %1721 = vmatpush1.bf16.msra.mxu1 %v3028_v43  ;;  %v3256_v43 = vsub.s32 1, %v3247_v33 }
 0x145   :  { %1722 = vmatprep.subr.bf16.mxu1 %v3034_v47  ;;  %v280_v47 = vrot.slane %v275_v41, %v3252_v37 }
 0x146   :  { %v284_v50 = vrot.slane %v275_v41, %v3256_v43  ;;  %v3337_v41 = vld [vmem:[#allocation8 + $0x1b4] ss:$8 sps:$4 sm:$0xff]  }
 0x148   :  { %1723 = vmatpush1.bf16.msra.mxu1 %v3040_v1 }
 0x149   :  { %1833 = vmatprep.subr.bf16.mxu1 %v3046_v54 }
 0x14b   :  { %1725 = vmatmul.mubr.bf16.vlgmr.msra.gmra.mrb[4].mxu1 %v3219_v25 }
 0x14c   :  { %1834 = vmatpush1.bf16.msra.mxu1 %v3050_v58 }
 0x14d   :  { %1835 = vmatprep.subr.bf16.mxu1 %v3054_v31 }
 0x150   :  { %1836 = vmatpush1.bf16.msra.mxu1 %v3058_v60 }
 0x151   :  { %1837 = vmatprep.subr.bf16.mxu1 %v3062_v7 }
 0x154   :  { %1838 = vmatpush1.bf16.msra.mxu1 %v3066_v0 }
 0x155   :  { %1839 = vmatprep.subr.bf16.mxu1 %v3070_v2 }
 0x158   :  { %1840 = vmatpush1.bf16.msra.mxu1 %v3074_v4 }
 0x159   :  { %1841 = vmatprep.subr.bf16.mxu1 %v3078_v6 }
 0x15c   :  { %1842 = vmatpush1.bf16.msra.mxu1 %v3082_v8 }
 0x15d   :  { %1843 = vmatprep.subr.bf16.mxu1 %v3086_v10 }
 0x160   :  { %1844 = vmatpush1.bf16.msra.mxu1 %v3090_v12 }
 0x161   :  { %1845 = vmatprep.subr.bf16.mxu1 %v3094_v14 }
 0x164   :  { %1846 = vmatpush1.bf16.msra.mxu1 %v3098_v16 }
 0x165   :  { %1847 = vmatprep.subr.bf16.mxu1 %v3102_v18 }
 0x168   :  { %1848 = vmatpush1.bf16.msra.mxu1 %v3106_v20 }
 0x169   :  { %1849 = vmatprep.subr.bf16.mxu1 %v3110_v22 }
 0x16c   :  { %1850 = vmatpush1.bf16.msra.mxu1 %v3114_v24 }
 0x16d   :  { %1851 = vmatprep.subr.bf16.mxu1 %v3118_v26  ;;  %v3275_v26 = vld [vmem:[#allocation8 + $0x100] ss:$8 sps:$4 sm:$0xff]  }
 0x170   :  { %1852 = vmatpush1.bf16.msra.mxu1 %v3122_v28  ;;  %v3277_v28 = vld [vmem:[#allocation8 + $0x114] ss:$8 sps:$4 sm:$0xff]  }
 0x171   :  { %1853 = vmatprep.subr.bf16.mxu1 %v3126_v30  ;;  %v3280_v30 = vld [vmem:[#allocation8 + $0x110] ss:$8 sps:$4 sm:$0xff]  }
 0x174   :  { %1854 = vmatpush1.bf16.msra.mxu1 %v3130_v32  ;;  %v3283_v32 = vld [vmem:[#allocation8 + $0x124] ss:$8 sps:$4 sm:$0xff]  }
 0x175   :  { %1855 = vmatprep.subr.bf16.mxu1 %v3134_v34  ;;  %v3286_v34 = vld [vmem:[#allocation8 + $0x120] ss:$8 sps:$4 sm:$0xff]  }
 0x178   :  { %1856 = vmatpush1.bf16.msra.mxu1 %v3138_v36  ;;  %v3289_v36 = vld [vmem:[#allocation8 + $0x134] ss:$8 sps:$4 sm:$0xff]  }
 0x179   :  { %1857 = vmatprep.subr.bf16.mxu1 %v3142_v38  ;;  %v3292_v38 = vld [vmem:[#allocation8 + $0x130] ss:$8 sps:$4 sm:$0xff]  }
 0x17c   :  { %1858 = vmatpush1.bf16.msra.mxu1 %v3146_v40  ;;  %v3295_v40 = vld [vmem:[#allocation8 + $0x144] ss:$8 sps:$4 sm:$0xff]  }
 0x17d   :  { %1859 = vmatprep.subr.bf16.mxu1 %v3150_v42  ;;  %v3298_v42 = vld [vmem:[#allocation8 + $0x140] ss:$8 sps:$4 sm:$0xff]  }
 0x180   :  { %1860 = vmatpush1.bf16.msra.mxu1 %v3154_v44  ;;  %v3301_v44 = vld [vmem:[#allocation8 + $0x154] ss:$8 sps:$4 sm:$0xff]  }
 0x181   :  { %1861 = vmatprep.subr.bf16.mxu1 %v3165_v46  ;;  %v3304_v46 = vld [vmem:[#allocation8 + $0x150] ss:$8 sps:$4 sm:$0xff]  }
 0x184   :  { %1862 = vmatpush1.bf16.msra.mxu1 %v3167_v49  ;;  %v3307_v49 = vld [vmem:[#allocation8 + $0x164] ss:$8 sps:$4 sm:$0xff]  }
 0x185   :  { %1863 = vmatprep.subr.bf16.mxu1 %v3171_v51  ;;  %v3310_v51 = vld [vmem:[#allocation8 + $0x160] ss:$8 sps:$4 sm:$0xff]  }
 0x188   :  { %1864 = vmatpush1.bf16.msra.mxu1 %v3173_v53  ;;  %v3313_v53 = vld [vmem:[#allocation8 + $0x174] ss:$8 sps:$4 sm:$0xff]  }
 0x189   :  { %1876 = vmatprep.subr.bf16.mxu1 %v3182_v59  ;;  %v3316_v59 = vld [vmem:[#allocation8 + $0x170] ss:$8 sps:$4 sm:$0xff]  }
 0x19e   :  { %v1034_v54 = vpop.f32.mrb[0].mxu0  ;;  %v1120_v56 = vpop.f32.mrb[0].mxu1 }
 0x19f   :  { %v2163_v58 = vadd.f32 %v1034_v54, %v280_v47  ;;  %v2167_v62 = vadd.f32 %v1120_v56, %v288_v48  ;;  %v1036_v1 = vpop.f32.mrb[1].mxu0  ;;  %v1122_v5 = vpop.f32.mrb[1].mxu1  ;;  %v3352_v54 = vld [vmem:[#allocation8 + $0x1d0] ss:$8 sps:$4 sm:$0xff]   ;;  %v3355_v56 = vld [vmem:[#allocation8 + $0x1e4] ss:$8 sps:$4 sm:$0xff]  }
 0x1a0   :  { %v2164_v7 = vadd.f32 %v1036_v1, %v284_v50  ;;  %v2168_v11 = vadd.f32 %v1122_v5, %v292_v52  ;;  %v1038_v15 = vpop.f32.mrb[2].mxu0  ;;  %v1124_v19 = vpop.f32.mrb[2].mxu1  ;;  %v3364_v1 = vld [vmem:[#allocation8 + $0x1f0] ss:$8 sps:$4 sm:$0xff]   ;;  %v2520_v5 = vld [vmem:[#allocation7 + $0xc] ss:$16 sps:$4 sm:$0xff]  }
 0x1a1   :  { %v1131_v23 = vmax.f32 %v2167_v62, 0.0  ;;  %v2165_v27 = vadd.f32 %v1038_v15, %v280_v47  ;;  %v2169_v31 = vadd.f32 %v1124_v19, %v288_v48  ;;  %v1040_v35 = vpop.f32.mrb[3].mxu0  ;;  %v1126_v60 = vpop.f32.mrb[3].mxu1  ;;  %v1129_v4 = vmax.f32 %v2163_v58, 0.0  ;;  %v3340_v47 = vld [vmem:[#allocation8 + $0x1b0] ss:$8 sps:$4 sm:$0xff]  }
 0x1a2   :  { %v2166_v0 = vadd.f32 %v1040_v35, %v284_v50  ;;  %v2170_v2 = vadd.f32 %v1126_v60, %v292_v52  ;;  %v1130_v10 = vmax.f32 %v2164_v7, 0.0  ;;  %v1132_v12 = vmax.f32 %v2168_v11, 0.0  ;;  %v3343_v48 = vld [vmem:[#allocation8 + $0x1c4] ss:$8 sps:$4 sm:$0xff]   ;;  %v3346_v50 = vld [vmem:[#allocation8 + $0x1c0] ss:$8 sps:$4 sm:$0xff]  }
 0x1a3   :  { %v1133_v6 = vmax.f32 %v2165_v27, 0.0  ;;  %v1135_v8 = vmax.f32 %v2169_v31, 0.0  ;;  %v3349_v52 = vld [vmem:[#allocation8 + $0x1d4] ss:$8 sps:$4 sm:$0xff]   ;;  %v3358_v58 = vld [vmem:[#allocation8 + $0x1e0] ss:$8 sps:$4 sm:$0xff]  }
 0x1a4   :  { %v1134_v14 = vmax.f32 %v2166_v0, 0.0  ;;  %v1136_v16 = vmax.f32 %v2170_v2, 0.0  ;;  %v3361_v62 = vld [vmem:[#allocation8 + $0x1f4] ss:$8 sps:$4 sm:$0xff]   ;;  %v2521_v7 = vld [vmem:[#allocation7 + $0x8] ss:$16 sps:$4 sm:$0xff]  }
 0x1a5   :  { %v1137_v18 = vpack.c.bf16 %v1133_v6, %v1129_v4  ;;  %v3272_v20 = vpack.c.bf16 %v1135_v8, %v1131_v23  ;;  %v2522_v11 = vld [vmem:[#allocation7 + $0x2c] ss:$16 sps:$4 sm:$0xff]   ;;  %v2523_v15 = vld [vmem:[#allocation7 + $0x28] ss:$16 sps:$4 sm:$0xff]  }
 0x1a6   :  { %v1138_v22 = vpack.c.bf16 %v1134_v14, %v1130_v10  ;;  %v1140_v24 = vpack.c.bf16 %v1136_v16, %v1132_v12  ;;  %v2524_v19 = vld [vmem:[#allocation7 + $0x4c] ss:$16 sps:$4 sm:$0xff]   ;;  %v2525_v23 = vld [vmem:[#allocation7 + $0x48] ss:$16 sps:$4 sm:$0xff]  }
 0x1a7   :  { %v2526_v27 = vld [vmem:[#allocation7 + $0x6c] ss:$16 sps:$4 sm:$0xff]   ;;  %v2527_v31 = vld [vmem:[#allocation7 + $0x68] ss:$16 sps:$4 sm:$0xff]  }
 0x1a8   :  { %1504 = vmatprep.mubr.bf16.mxu0 %v1138_v22  ;;  %v2528_v35 = vld [vmem:[#allocation7 + $0x8c] ss:$16 sps:$4 sm:$0xff]   ;;  %v2529_v60 = vld [vmem:[#allocation7 + $0x88] ss:$16 sps:$4 sm:$0xff]  }
 0x1a9   :  { %1505 = vmatmul.mubr.bf16.vlgmr.msra.gmra.mrb[4].mxu0 %v1137_v18  ;;  %v2530_v0 = vld [vmem:[#allocation7 + $0xac] ss:$16 sps:$4 sm:$0xff]   ;;  %v2531_v2 = vld [vmem:[#allocation7 + $0xa8] ss:$16 sps:$4 sm:$0xff]  }
 0x1aa   :  { %1516 = vmatpush1.bf16.msra.mxu0 %v3275_v26  ;;  %1547 = vmatprep.mubr.bf16.mxu0 %v1140_v24  ;;  %v2533_v4 = vld [vmem:[#allocation7 + $0xc8] ss:$16 sps:$4 sm:$0xff]   ;;  %v2534_v6 = vld [vmem:[#allocation7 + $0xec] ss:$16 sps:$4 sm:$0xff]  }
 0x1ab   :  { %1517 = vmatprep.subr.bf16.mxu0 %v3277_v28  ;;  %v2535_v8 = vld [vmem:[#allocation7 + $0xe8] ss:$16 sps:$4 sm:$0xff]   ;;  %v2536_v10 = vld [vmem:[#allocation7 + $0x10c] ss:$16 sps:$4 sm:$0xff]  }
 0x1ac   :  { %v2537_v12 = vld [vmem:[#allocation7 + $0x108] ss:$16 sps:$4 sm:$0xff]   ;;  %v2538_v14 = vld [vmem:[#allocation7 + $0x12c] ss:$16 sps:$4 sm:$0xff]  }
 0x1ad   :  { %v2539_v16 = vld [vmem:[#allocation7 + $0x128] ss:$16 sps:$4 sm:$0xff]   ;;  %v2540_v18 = vld [vmem:[#allocation7 + $0x14c] ss:$16 sps:$4 sm:$0xff]  }
 0x1ae   :  { %1518 = vmatpush1.bf16.msra.mxu0 %v3280_v30  ;;  %v2542_v22 = vld [vmem:[#allocation7 + $0x16c] ss:$16 sps:$4 sm:$0xff]   ;;  %v2543_v24 = vld [vmem:[#allocation7 + $0x168] ss:$16 sps:$4 sm:$0xff]  }
 0x1af   :  { %1519 = vmatprep.subr.bf16.mxu0 %v3283_v32 }
 0x1b2   :  { %1520 = vmatpush1.bf16.msra.mxu0 %v3286_v34 }
 0x1b3   :  { %1521 = vmatprep.subr.bf16.mxu0 %v3289_v36 }
 0x1b6   :  { %1522 = vmatpush1.bf16.msra.mxu0 %v3292_v38 }
 0x1b7   :  { %1523 = vmatprep.subr.bf16.mxu0 %v3295_v40 }
 0x1ba   :  { %1524 = vmatpush1.bf16.msra.mxu0 %v3298_v42 }
 0x1bb   :  { %1525 = vmatprep.subr.bf16.mxu0 %v3301_v44 }
 0x1be   :  { %1526 = vmatpush1.bf16.msra.mxu0 %v3304_v46 }
 0x1bf   :  { %1527 = vmatprep.subr.bf16.mxu0 %v3307_v49 }
 0x1c2   :  { %1528 = vmatpush1.bf16.msra.mxu0 %v3310_v51 }
 0x1c3   :  { %1529 = vmatprep.subr.bf16.mxu0 %v3313_v53 }
 0x1c6   :  { %1530 = vmatpush1.bf16.msra.mxu0 %v3316_v59 }
 0x1c7   :  { %1531 = vmatprep.subr.bf16.mxu0 %v3319_v61 }
 0x1ca   :  { %1532 = vmatpush1.bf16.msra.mxu0 %v3322_v63 }
 0x1cb   :  { %1533 = vmatprep.subr.bf16.mxu0 %v3325_v3 }
 0x1ce   :  { %1534 = vmatpush1.bf16.msra.mxu0 %v3328_v9 }
 0x1cf   :  { %1535 = vmatprep.subr.bf16.mxu0 %v3331_v13 }
 0x1d2   :  { %1536 = vmatpush1.bf16.msra.mxu0 %v3334_v17 }
 0x1d3   :  { %1537 = vmatprep.subr.bf16.mxu0 %v3337_v41 }
 0x1d6   :  { %1538 = vmatpush1.bf16.msra.mxu0 %v3340_v47 }
 0x1d7   :  { %1539 = vmatprep.subr.bf16.mxu0 %v3343_v48 }
 0x1da   :  { %1540 = vmatpush1.bf16.msra.mxu0 %v3346_v50 }
 0x1db   :  { %1541 = vmatprep.subr.bf16.mxu0 %v3349_v52 }
 0x1de   :  { %1542 = vmatpush1.bf16.msra.mxu0 %v3352_v54 }
 0x1df   :  { %1543 = vmatprep.subr.bf16.mxu0 %v3355_v56 }
 0x1e2   :  { %1544 = vmatpush1.bf16.msra.mxu0 %v3358_v58 }
 0x1e3   :  { %1545 = vmatprep.subr.bf16.mxu0 %v3361_v62 }
 0x1e6   :  { %1546 = vmatpush1.bf16.msra.mxu0 %v3364_v1 }
 0x1e7   :  { %1735 = vmatprep.subr.bf16.mxu0 %v2520_v5  ;;  %v2544_v5 = vld [vmem:[#allocation7 + $0x18c] ss:$16 sps:$4 sm:$0xff]  }
 0x1e9   :  { %1548 = vmatmul.mubr.bf16.vlgmr.msra.gmra.mrb[4].mxu0 %v3272_v20  ;;  %v2541_v20 = vld [vmem:[#allocation7 + $0x148] ss:$16 sps:$4 sm:$0xff]  }
 0x1ea   :  { %1736 = vmatpush1.bf16.msra.mxu0 %v2521_v7  ;;  %1767 = vmatprep.mubr.bf16.mxu0 %v3176_v55  ;;  %v2532_v55 = vld [vmem:[#allocation7 + $0xcc] ss:$16 sps:$4 sm:$0xff]   ;;  %v2545_v7 = vld [vmem:[#allocation7 + $0x188] ss:$16 sps:$4 sm:$0xff]  }
 0x1eb   :  { %1737 = vmatprep.subr.bf16.mxu0 %v2522_v11  ;;  %v2546_v11 = vld [vmem:[#allocation7 + $0x1ac] ss:$16 sps:$4 sm:$0xff]  }
 0x1ee   :  { %1738 = vmatpush1.bf16.msra.mxu0 %v2523_v15  ;;  %v2547_v15 = vld [vmem:[#allocation7 + $0x1a8] ss:$16 sps:$4 sm:$0xff]  }
 0x1ef   :  { %1739 = vmatprep.subr.bf16.mxu0 %v2524_v19  ;;  %v2548_v19 = vld [vmem:[#allocation7 + $0x1cc] ss:$16 sps:$4 sm:$0xff]  }
 0x1f2   :  { %1740 = vmatpush1.bf16.msra.mxu0 %v2525_v23  ;;  %v2549_v23 = vld [vmem:[#allocation7 + $0x1c8] ss:$16 sps:$4 sm:$0xff]  }
 0x1f3   :  { %1741 = vmatprep.subr.bf16.mxu0 %v2526_v27  ;;  %v2550_v27 = vld [vmem:[#allocation7 + $0x1ec] ss:$16 sps:$4 sm:$0xff]  }
 0x1f6   :  { %1742 = vmatpush1.bf16.msra.mxu0 %v2527_v31  ;;  %v2551_v31 = vld [vmem:[#allocation7 + $0x1e8] ss:$16 sps:$4 sm:$0xff]  }
 0x1f7   :  { %1743 = vmatprep.subr.bf16.mxu0 %v2528_v35  ;;  %v2552_v35 = vld [vmem:[#allocation7 + $0x20c] ss:$16 sps:$4 sm:$0xff]  }
 0x1fa   :  { %1744 = vmatpush1.bf16.msra.mxu0 %v2529_v60  ;;  %v2553_v60 = vld [vmem:[#allocation7 + $0x208] ss:$16 sps:$4 sm:$0xff]  }
 0x1fb   :  { %1745 = vmatprep.subr.bf16.mxu0 %v2530_v0  ;;  %v2554_v0 = vld [vmem:[#allocation7 + $0x22c] ss:$16 sps:$4 sm:$0xff]  }
 0x1fe   :  { %1746 = vmatpush1.bf16.msra.mxu0 %v2531_v2  ;;  %v2555_v2 = vld [vmem:[#allocation7 + $0x228] ss:$16 sps:$4 sm:$0xff]  }
 0x1ff   :  { %1747 = vmatprep.subr.bf16.mxu0 %v2532_v55  ;;  %v2556_v55 = vld [vmem:[#allocation7 + $0x24c] ss:$16 sps:$4 sm:$0xff]  }
 0x202   :  { %1748 = vmatpush1.bf16.msra.mxu0 %v2533_v4  ;;  %v2557_v4 = vld [vmem:[#allocation7 + $0x248] ss:$16 sps:$4 sm:$0xff]  }
 0x203   :  { %1749 = vmatprep.subr.bf16.mxu0 %v2534_v6  ;;  %v2558_v6 = vld [vmem:[#allocation7 + $0x26c] ss:$16 sps:$4 sm:$0xff]  }
 0x206   :  { %1750 = vmatpush1.bf16.msra.mxu0 %v2535_v8  ;;  %v3372_v8 = vld [vmem:[#allocation5 + $0x1] ss:$2 sm:$0xf] }
 0x207   :  { %1751 = vmatprep.subr.bf16.mxu0 %v2536_v10  ;;  %v2559_v10 = vld [vmem:[#allocation7 + $0x268] ss:$16 sps:$4 sm:$0xff]  }
 0x20a   :  { %1752 = vmatpush1.bf16.msra.mxu0 %v2537_v12  ;;  %v3554_v12 = vld [vmem:[#allocation15_spill] sm:$0xff] }
 0x20b   :  { %1753 = vmatprep.subr.bf16.mxu0 %v2538_v14  ;;  %v3555_v14 = vld [vmem:[#allocation16_spill] sm:$0xff] }
 0x20e   :  { %1754 = vmatpush1.bf16.msra.mxu0 %v2539_v16 }
 0x20f   :  { %1755 = vmatprep.subr.bf16.mxu0 %v2540_v18  ;;  %v3556_v18 = vld [vmem:[#allocation17_spill] sm:$0xff] }
 0x212   :  { %1756 = vmatpush1.bf16.msra.mxu0 %v2541_v20 }
 0x213   :  { %1757 = vmatprep.subr.bf16.mxu0 %v2542_v22 }
 0x216   :  { %1758 = vmatpush1.bf16.msra.mxu0 %v2543_v24 }
 0x217   :  { %1759 = vmatprep.subr.bf16.mxu0 %v2544_v5 }
 0x21a   :  { %1760 = vmatpush1.bf16.msra.mxu0 %v2545_v7 }
 0x21b   :  { %1761 = vmatprep.subr.bf16.mxu0 %v2546_v11  ;;  %v3557_v11 = vld [vmem:[#allocation18_spill] sm:$0xff] }
 0x21e   :  { %1762 = vmatpush1.bf16.msra.mxu0 %v2547_v15  ;;  %v1726_v16 = vpop.f32.mrb[4].mxu1 }
 0x21f   :  { %1763 = vmatprep.subr.bf16.mxu0 %v2548_v19  ;;  %v1728_v22 = vpop.f32.mrb[5].mxu1 }
 0x220   :  { %v1730_v5 = vpop.f32.mrb[6].mxu1 }
 0x221   :  { %v1732_v7 = vpop.f32.mrb[7].mxu1 }
 0x222   :  { %1764 = vmatpush1.bf16.msra.mxu0 %v2549_v23  ;;  %v3558_v23 = vld [vmem:[#allocation19_spill] sm:$0xff] }
 0x223   :  { %1765 = vmatprep.subr.bf16.mxu0 %v2550_v27 }
 0x226   :  { %1766 = vmatpush1.bf16.msra.mxu0 %v2551_v31 }
 0x227   :  { %1778 = vmatprep.subr.bf16.mxu0 %v2552_v35 }
 0x229   :  { %1768 = vmatmul.mubr.bf16.vlgmr.msra.gmra.mrb[8].mxu0 %v3179_v57  ;;  %v1612_v57 = vrot.slane %v3372_v8, %v3252_v37 }
 0x22a   :  { %1779 = vmatpush1.bf16.msra.mxu0 %v2553_v60  ;;  %1810 = vmatprep.mubr.bf16.mxu0 %v3217_v21  ;;  %v1616_v21 = vrot.slane %v3372_v8, %v3256_v43 }
 0x22b   :  { %1780 = vmatprep.subr.bf16.mxu0 %v2554_v0  ;;  %v2175_v20 = vadd.f32 %v1726_v16, %v1612_v57  ;;  %v2177_v31 = vadd.f32 %v1730_v5, %v1612_v57  ;;  %v3559_v0 = vld [vmem:[#allocation20_spill] sm:$0xff]  ;;  %v3564_v57 = vld [vmem:[#allocation25_spill] sm:$0xff] }
 0x22c   :  { %v2176_v24 = vadd.f32 %v1728_v22, %v1616_v21  ;;  %v2178_v19 = vadd.f32 %v1732_v7, %v1616_v21  ;;  %v3565_v21 = vld [vmem:[#allocation26_spill] sm:$0xff] }
 0x22d   :  { %v1821_v27 = vmax.f32 %v2175_v20, 0.0  ;;  %v1825_v60 = vmax.f32 %v2177_v31, 0.0  ;;  %v1624_v20 = vrot.slane %v3372_v8, %v291_v45 }
 0x22e   :  { %1781 = vmatpush1.bf16.msra.mxu0 %v2555_v2  ;;  %v1822_v15 = vmax.f32 %v2176_v24, 0.0  ;;  %v1826_v35 = vmax.f32 %v2178_v19, 0.0 }
 0x22f   :  { %1782 = vmatprep.subr.bf16.mxu0 %v2556_v55  ;;  %v3560_v55 = vld [vmem:[#allocation21_spill] sm:$0xff] }
 0x230   :  { %v1830_v2 = vpack.c.bf16 %v1826_v35, %v1822_v15 }
 0x232   :  { %1783 = vmatpush1.bf16.msra.mxu0 %v2557_v4  ;;  %v1829_v4 = vpack.c.bf16 %v1825_v60, %v1821_v27  ;;  %1865 = vmatprep.mubr.bf16.mxu1 %v1830_v2 }
 0x233   :  { %1784 = vmatprep.subr.bf16.mxu0 %v2558_v6  ;;  %v3561_v6 = vld [vmem:[#allocation22_spill] sm:$0xff] }
 0x234   :  { %1866 = vmatmul.mubr.bf16.vlgmr.msra.gmra.mrb[8].mxu1 %v1829_v4 }
 0x235   :  { %1877 = vmatpush1.bf16.msra.mxu1 %v3275_v26  ;;  %v3567_v26 = vld [vmem:[#allocation30_spill] sm:$0xff] }
 0x236   :  { %1785 = vmatpush1.bf16.msra.mxu0 %v2559_v10  ;;  %v3562_v10 = vld [vmem:[#allocation23_spill] sm:$0xff]  ;;  %1878 = vmatprep.subr.bf16.mxu1 %v3277_v28  ;;  %v3568_v28 = vld [vmem:[#allocation32_spill] sm:$0xff] }
 0x237   :  { %1786 = vmatprep.subr.bf16.mxu0 %v3554_v12  ;;  %v3563_v12 = vld [vmem:[#allocation24_spill] sm:$0xff] }
 0x239   :  { %1879 = vmatpush1.bf16.msra.mxu1 %v3280_v30  ;;  %v3569_v30 = vld [vmem:[#allocation33_spill] sm:$0xff] }
 0x23a   :  { %1787 = vmatpush1.bf16.msra.mxu0 %v3555_v14  ;;  %1880 = vmatprep.subr.bf16.mxu1 %v3283_v32  ;;  %v3566_v14 = vld [vmem:[#allocation28_spill] sm:$0xff]  ;;  %v3570_v32 = vld [vmem:[#allocation35_spill] sm:$0xff] }
 0x23b   :  { %1788 = vmatprep.subr.bf16.mxu0 %v3556_v18 }
 0x23d   :  { %1881 = vmatpush1.bf16.msra.mxu1 %v3286_v34  ;;  %v3571_v34 = vld [vmem:[#allocation37_spill] sm:$0xff] }
 0x23e   :  { %1789 = vmatpush1.bf16.msra.mxu0 %v3557_v11  ;;  %1882 = vmatprep.subr.bf16.mxu1 %v3289_v36  ;;  %v3572_v36 = vld [vmem:[#allocation38_spill] sm:$0xff] }
 0x23f   :  { %1790 = vmatprep.subr.bf16.mxu0 %v3558_v23 }
 0x241   :  { %1883 = vmatpush1.bf16.msra.mxu1 %v3292_v38  ;;  %v3573_v38 = vld [vmem:[#allocation39_spill] sm:$0xff] }
 0x242   :  { %1791 = vmatpush1.bf16.msra.mxu0 %v3559_v0  ;;  %1884 = vmatprep.subr.bf16.mxu1 %v3295_v40  ;;  %v3574_v40 = vld [vmem:[#allocation41_spill] sm:$0xff] }
 0x243   :  { %1792 = vmatprep.subr.bf16.mxu0 %v3560_v55 }
 0x245   :  { %1885 = vmatpush1.bf16.msra.mxu1 %v3298_v42  ;;  %v3575_v42 = vld [vmem:[#allocation42_spill] sm:$0xff] }
 0x246   :  { %1793 = vmatpush1.bf16.msra.mxu0 %v3561_v6  ;;  %1886 = vmatprep.subr.bf16.mxu1 %v3301_v44  ;;  %v3576_v44 = vld [vmem:[#allocation43_spill] sm:$0xff] }
 0x247   :  { %1794 = vmatprep.subr.bf16.mxu0 %v3562_v10 }
 0x249   :  { %1887 = vmatpush1.bf16.msra.mxu1 %v3304_v46  ;;  %v3577_v46 = vld [vmem:[#allocation44_spill] sm:$0xff] }
 0x24a   :  { %1795 = vmatpush1.bf16.msra.mxu0 %v3563_v12  ;;  %1888 = vmatprep.subr.bf16.mxu1 %v3307_v49 }
 0x24b   :  { %1796 = vmatprep.subr.bf16.mxu0 %v3564_v57 }
 0x24d   :  { %1889 = vmatpush1.bf16.msra.mxu1 %v3310_v51 }
 0x24e   :  { %1797 = vmatpush1.bf16.msra.mxu0 %v3565_v21  ;;  %1890 = vmatprep.subr.bf16.mxu1 %v3313_v53  ;;  %v270_v53 = vld [vmem:[%s3486_s5] sm:$0x3] }
 0x24f   :  { %1798 = vmatprep.subr.bf16.mxu0 %v3566_v14 }
 0x251   :  { %1891 = vmatpush1.bf16.msra.mxu1 %v3316_v59 }
 0x252   :  { %1799 = vmatpush1.bf16.msra.mxu0 %v3567_v26  ;;  %1892 = vmatprep.subr.bf16.mxu1 %v3319_v61 }
 0x253   :  { %1800 = vmatprep.subr.bf16.mxu0 %v3568_v28 }
 0x255   :  { %1893 = vmatpush1.bf16.msra.mxu1 %v3322_v63 }
 0x256   :  { %1801 = vmatpush1.bf16.msra.mxu0 %v3569_v30  ;;  %1894 = vmatprep.subr.bf16.mxu1 %v3325_v3  ;;  %v3445_v3 = vrot.slane %v270_v53, %v3252_v37 }
 0x257   :  { %1802 = vmatprep.subr.bf16.mxu0 %v3570_v32 }
 0x259   :  { %1895 = vmatpush1.bf16.msra.mxu1 %v3328_v9 }
 0x25a   :  { %1803 = vmatpush1.bf16.msra.mxu0 %v3571_v34  ;;  %1896 = vmatprep.subr.bf16.mxu1 %v3331_v13 }
 0x25b   :  { %1804 = vmatprep.subr.bf16.mxu0 %v3572_v36 }
 0x25d   :  { %1897 = vmatpush1.bf16.msra.mxu1 %v3334_v17  ;;  %v1570_v17 = vrot.slane %v270_v53, %v3256_v43 }
 0x25e   :  { %1805 = vmatpush1.bf16.msra.mxu0 %v3573_v38  ;;  %1898 = vmatprep.subr.bf16.mxu1 %v3337_v41 }
 0x25f   :  { %1806 = vmatprep.subr.bf16.mxu0 %v3574_v40 }
 0x261   :  { %1899 = vmatpush1.bf16.msra.mxu1 %v3340_v47 }
 0x262   :  { %1807 = vmatpush1.bf16.msra.mxu0 %v3575_v42  ;;  %1900 = vmatprep.subr.bf16.mxu1 %v3343_v48 }
 0x263   :  { %1808 = vmatprep.subr.bf16.mxu0 %v3576_v44 }
 0x265   :  { %1901 = vmatpush1.bf16.msra.mxu1 %v3346_v50 }
 0x266   :  { %1809 = vmatpush1.bf16.msra.mxu0 %v3577_v46  ;;  %1902 = vmatprep.subr.bf16.mxu1 %v3349_v52 }
 0x269   :  { %1811 = vmatmul.mubr.bf16.vlgmr.msra.gmra.mrb[8].mxu0 %v3219_v25  ;;  %1903 = vmatpush1.bf16.msra.mxu1 %v3352_v54  ;;  %v269_v25 = vld [vmem:[%s3485_s4] sm:$0x3]  ;;  %s2686_s4 = smov [#allocation10]  }
 0x26a   :  { %1904 = vmatprep.subr.bf16.mxu1 %v3355_v56  ;;  %v1145_v49 = vrot.slane %v269_v25, %v3252_v37  ;;  %v3439_v51 = vrot.slane %v269_v25, %v3256_v43  ;;  %v1620_v43 = vrot.slane %v3372_v8, %v287_v39  ;;  %v1586_v39 = vand.u32 127, %v277_v29  ;;  %s1952_s5 = sshll.u32 %s2686_s4, 4  ;;  %s1953_s5 = int_to_ptr.vmem [resolvable:$true] %s1952_s5 }
 0x26b   :  { %s2648_s25 = scalar_lea.vmem %s1953_s5, 32  ;;  %p2653_p5 = scmp.lt.s32.totalorder %s1953_s5, %s1953_s5 }
 0x26c   :  { %v1591_v55 = vadd.s32 4294967288, %v1586_v39  ;;  %v1589_v8 = vsub.s32 %v1586_v39, %v3247_v33  ;;  %p2649_p4 = scmp.ne.s32.totalorder %s1953_s5, %s2648_s25  ;;  %p2654_p6 = scmp.lt.s32.totalorder %s2648_s25, %s2648_s25 }
 0x26d   :  { %1905 = vmatpush1.bf16.msra.mxu1 %v3358_v58 }
 0x26e   :  { %1906 = vmatprep.subr.bf16.mxu1 %v3361_v62  ;;  %v1594_v4 = vsub.s32 %v1591_v55, %v3247_v33  ;;  %p2655_p7 = por %p2654_p6, %p2653_p5 }
 0x270   :  { %p2656_p8 = pnand %p2655_p7, %p2649_p4 }
 0x271   :  { %1907 = vmatpush1.bf16.msra.mxu1 %v3364_v1 }
 0x2bc   :  { %v1549_v59 = vpop.f32.mrb[4].mxu0 }
 0x2bd   :  { %v2171_v61 = vadd.f32 %v1549_v59, %v1145_v49  ;;  %v1551_v63 = vpop.f32.mrb[5].mxu0 }
 0x2be   :  { %v2172_v9 = vadd.f32 %v1551_v63, %v3439_v51  ;;  %v1553_v13 = vpop.f32.mrb[6].mxu0 }
 0x2bf   :  { %v1558_v41 = vmax.f32 %v2171_v61, 0.0  ;;  %v2173_v47 = vadd.f32 %v1553_v13, %v1145_v49  ;;  %v1555_v48 = vpop.f32.mrb[7].mxu0 }
 0x2c0   :  { %v1559_v50 = vmax.f32 %v2172_v9, 0.0  ;;  %v2174_v52 = vadd.f32 %v1555_v48, %v3439_v51 }
 0x2c1   :  { %v1560_v54 = vmax.f32 %v2173_v47, 0.0  ;;  %v1573_v56 = vmul.f32 %v3445_v3, %v1558_v41 }
 0x2c2   :  { %v1561_v58 = vmax.f32 %v2174_v52, 0.0  ;;  %v1574_v62 = vmul.f32 %v1570_v17, %v1559_v50 }
 0x2c3   :  { %v1575_v1 = vmul.f32 %v3445_v3, %v1560_v54 }
 0x2c4   :  { %v1576_v37 = vmul.f32 %v1570_v17, %v1561_v58  ;;  %v1577_v16 = vadd.f32 %v1574_v62, %v1573_v56 }
 0x2c6   :  { %1578 = vadd.xlane.f32.xlu0 %v1577_v16  ;;  %v1580_v18 = vadd.f32 %v1576_v37, %v1575_v1 }
 0x2ca   :  { %1581 = vadd.xlane.f32.xlu0 %v1580_v18 }
 0x33c   :  { %v1812_v22 = vpop.f32.mrb[8].mxu0 }
 0x33d   :  { %v2179_v24 = vadd.f32 %v1812_v22, %v1620_v43  ;;  %v1814_v5 = vpop.f32.mrb[9].mxu0 }
 0x33e   :  { %v2180_v7 = vadd.f32 %v1814_v5, %v1624_v20  ;;  %v1816_v11 = vpop.f32.mrb[10].mxu0 }
 0x33f   :  { %v2181_v15 = vadd.f32 %v1816_v11, %v1620_v43  ;;  %v1818_v19 = vpop.f32.mrb[11].mxu0  ;;  %v1823_v27 = vmax.f32 %v2179_v24, 0.0 }
 0x340   :  { %v2182_v23 = vadd.f32 %v1818_v19, %v1624_v20  ;;  %v1824_v35 = vmax.f32 %v2180_v7, 0.0 }
 0x341   :  { %v1827_v31 = vmax.f32 %v2181_v15, 0.0 }
 0x342   :  { %v1828_v60 = vmax.f32 %v2182_v23, 0.0 }
 0x343   :  { %v1831_v0 = vpack.c.bf16 %v1827_v31, %v1823_v27 }
 0x344   :  { %v1832_v2 = vpack.c.bf16 %v1828_v60, %v1824_v35 }
 0x346   :  { %1908 = vmatprep.mubr.bf16.mxu1 %v1832_v2 }
 0x347   :  { %1909 = vmatmul.mubr.bf16.vlgmr.msra.gmra.mrb[8].mxu1 %v1831_v0 }
 0x353   :  { %v1579_v45 = vpop.xlane.xlu0 %1578 }
 0x354   :  { %v1590_v10 = vrot.slane %v1579_v45, %v1589_v8 }
 0x357   :  { %v1582_v6 = vpop.xlane.xlu0 %1581 }
 0x358   :  { %v1595_v12 = vrot.slane %v1582_v6, %v1594_v4 }
 0x35a   :  { %v1597_v57 = vsel %vm1596_vm0, %v1595_v12, %v1590_v10 }
 0x35b   :  { %1600 = vst.msk [vmem:[#allocation10] sm:$0x1] %vm1599_vm1, %v1597_v57 }
 0x41a   :  { %v1910_v21 = vpop.f32.mrb[8].mxu1 }
 0x41b   :  { %v2183_v14 = vadd.f32 %v1910_v21, %v1145_v49  ;;  %v1912_v26 = vpop.f32.mrb[9].mxu1 }
 0x41c   :  { %v2184_v29 = vadd.f32 %v1912_v26, %v3439_v51  ;;  %v1914_v28 = vpop.f32.mrb[10].mxu1 }
 0x41d   :  { %v1919_v30 = vmax.f32 %v2183_v14, 0.0  ;;  %v2185_v32 = vadd.f32 %v1914_v28, %v1145_v49  ;;  %v1916_v34 = vpop.f32.mrb[11].mxu1 }
 0x41e   :  { %v1920_v36 = vmax.f32 %v2184_v29, 0.0  ;;  %v2186_v33 = vadd.f32 %v1916_v34, %v3439_v51 }
 0x41f   :  { %v1921_v38 = vmax.f32 %v2185_v32, 0.0  ;;  %v1923_v40 = vmul.f32 %v1919_v30, %v3445_v3 }
 0x420   :  { %v1922_v42 = vmax.f32 %v2186_v33, 0.0  ;;  %v1924_v44 = vmul.f32 %v1920_v36, %v1570_v17 }
 0x421   :  { %v1925_v46 = vmul.f32 %v1921_v38, %v3445_v3 }
 0x422   :  { %v1926_v25 = vmul.f32 %v1922_v42, %v1570_v17  ;;  %v1927_v53 = vadd.f32 %v1924_v44, %v1923_v40 }
 0x424   :  { %1928 = vadd.xlane.f32.xlu1 %v1927_v53  ;;  %v1930_v59 = vadd.f32 %v1926_v25, %v1925_v46 }
 0x428   :  { %1931 = vadd.xlane.f32.xlu1 %v1930_v59 }
 0x4b1   :  { %v1929_v61 = vpop.xlane.xlu1 %1928 }
 0x4b2   :  { %v1938_v63 = vrot.slane %v1929_v61, %v1589_v8 }
 0x4b5   :  { %v1932_v49 = vpop.xlane.xlu1 %1931 }
 0x4b6   :  { %v1942_v9 = vrot.slane %v1932_v49, %v1594_v4 }
 0x4b8   :  { %v1943_v51 = vsel %vm1596_vm0, %v1942_v9, %v1938_v63 }
 0x4b9   :  { %1945 = vst.msk [vmem:[#allocation10 + $0x1] sm:$0x1] %vm1599_vm1, %v1943_v51 }
 0x4ba   :  { %2659 = shalt.err (!%p2656_p8)
}
 0x4bb   :  { %s2660_s28 = scalar_lea.hbm %s3487_s6, 32 }
 0x4bc   :  { %p2661_p9 = scmp.ne.s32.totalorder %s3487_s6, %s2660_s28  ;;  %p2664_p10 = scmp.lt.u32.totalorder %s2660_s28, %s3487_s6 }
 0x4be   :  { %p2666_p11 = pnand %p2664_p10, %p2661_p9 }
 0x4c0   :  { %2669 = shalt.err (!%p2666_p11)
}
 0x4c1   :  { %1955 = dma.vmem_to_hbm [thread:$0]  %s1953_s5, 32, %s3487_s6, [#allocation4]  }
 0x4c2   :  { %2676 = dma.done.wait [#allocation4], 32  }
 0x4c3   :  { %2677 = vsyncadd [#allocation4], 4294967264 }
 0x4c4   :  { %1959 = vsyncpa [#allocation3], 1 }
 0x4c5   :  { %1960 = vsyncpa [#allocation6], 1 }
 0x4c6   :  { %1961 = vsyncpa [#allocation9], 1 }
 0x4c7   :  { %1962 = vsyncpa [#allocation4], 1 }

</bundles_post_ra>
